<compile_context>
chip_gen: v7x
topology: tpu7x:2x2x1
jax: 0.10.0
libtpu: 0.0.40
codegen_flags: <defaults>
</compile_context>

<pallas_src>
import functools

import jax
import jax.numpy as jnp
from jax.experimental import pallas as pl
from jax.experimental.pallas import tpu as pltpu

_MISH_SOFTPLUS_THRESHOLD = 20.0      # matches torch.nn.Softplus threshold
_SELU_ALPHA = 1.6732632423543772
_SELU_SCALE = 1.0507009873554805
_NEG_INF = -1e30                     # bias for padded cluster logits
_LANES = 128


def _round_up(x, m):
    return ((x + m - 1) // m) * m


def _mish(x):
    # log(1+exp(x)) (with the torch threshold branch) kept instead of log1p:
    # the accuracy delta only matters for very negative x, where mish(x) ~ 0
    # anyway, and log/exp are guaranteed Mosaic-lowerable.
    sp = jnp.where(
        x > _MISH_SOFTPLUS_THRESHOLD,
        x,
        jnp.log(1.0 + jnp.exp(jnp.minimum(x, _MISH_SOFTPLUS_THRESHOLD))),
    )
    return x * jnp.tanh(sp)


def _sum_all(a):
    # Full reduction kept 2-D ((1,1)) for clean TPU lowering.
    return jnp.sum(jnp.sum(a, axis=1, keepdims=True), axis=0, keepdims=True)


# ----------------------------------------------------------------------------
# Fused kernel: 3 chained SAGEConv('mean') + Mish layers (with the residual
# add before the third) followed by full DMoNPooling, for one graph per grid
# step.  All shapes are lane-padded: Dp = 128-padded feature dim,
# Cp = 128-padded cluster count.
# ----------------------------------------------------------------------------
def _conv_layer_kernel(x_ref, adj_ref, agg_ref,
                       wa_ref, ba_ref, wco_ref, bco_ref, wb_ref, bb_ref,
                       w1_ref, b1_ref, w2_ref, b2_ref,
                       out_ref, loss_ref, *, num_nodes, num_clusters):
    n_f = float(num_nodes)
    sqrt_c = float(num_clusters) ** 0.5

    x = x_ref[...]          # (N, Dp)
    adj = adj_ref[...]      # (N, N)
    agg = agg_ref[...]      # (N, N)

    def sage_mish(h, w_cat, b):
        # SAGEConv 'mean': lin_l(mean_agg(h)) + bias + lin_r(h), fused as one
        # K = 2*Dp matmul against Wcat = [Wl^T ; Wr^T], then Mish.
        h_agg = jnp.dot(agg, h, preferred_element_type=jnp.float32)      # (N, Dp)
        h_cat = jnp.concatenate([h_agg, h], axis=1)                      # (N, 2Dp)
        return _mish(jnp.dot(h_cat, w_cat, preferred_element_type=jnp.float32) + b)

    h1 = sage_mish(x, wa_ref[...], ba_ref[...])          # conv1 (g=0) / conv2 (g=1)
    hc = sage_mish(h1, wco_ref[...], bco_ref[...])       # co_conv (shared weights)
    h2 = sage_mish(h1 + hc, wb_ref[...], bb_ref[...])    # conv3 (g=0) / conv4 (g=1)

    # --- DMoNPooling -------------------------------------------------------
    # Cluster-assignment MLP (Linear -> Linear, act=None) + softmax.  Padded
    # cluster columns carry a -1e30 bias -> exp underflows to exactly 0.
    hm = jnp.dot(h2, w1_ref[...], preferred_element_type=jnp.float32) + b1_ref[...]
    logits = jnp.dot(hm, w2_ref[...], preferred_element_type=jnp.float32) + b2_ref[...]
    logits = logits - jnp.max(logits, axis=-1, keepdims=True)
    e = jnp.exp(logits)
    denom = jnp.sum(e, axis=-1, keepdims=True)
    s = e * pl.reciprocal(denom, approx=True)                             # (N, Cp)

    # Pooled node features: selu(S^T X), contracting dim 0 (no explicit S^T).
    sx = jax.lax.dot_general(s, h2, (((0,), (0,)), ((), ())),
                             preferred_element_type=jnp.float32)          # (Cp, Dp)
    out_ref[...] = _SELU_SCALE * jnp.where(sx > 0, sx,
                                           _SELU_ALPHA * (jnp.exp(sx) - 1.0))

    # Spectral loss: -tr(S^T A S - (S^T d)(d^T S)/2m) / 2m.
    adj_s = jnp.dot(adj, s, preferred_element_type=jnp.float32)           # (N, Cp)
    tr_pool_adj = _sum_all(s * adj_s)                                     # tr(S^T A S)
    # Column-sum degrees: matches PyG DMoNPooling's einsum('ijk->ik', adj);
    # identical to row sums for the (symmetric) undirected graphs used here.
    deg = jnp.sum(adj, axis=0, keepdims=True)                             # (1, N)
    m = 0.5 * jnp.sum(deg, axis=1, keepdims=True)                         # (1, 1)
    inv_2m = pl.reciprocal(2.0 * m, approx=True)
    ca = jnp.dot(deg, s, preferred_element_type=jnp.float32)              # (1, Cp)
    tr_norm = jnp.sum(ca * ca, axis=1, keepdims=True) * inv_2m
    spectral_loss = -(tr_pool_adj - tr_norm) * inv_2m

    # Orthogonality loss: || SS/||SS||_F - I/||I||_F ||_F,  SS = S^T S.
    ss = jax.lax.dot_general(s, s, (((0,), (0,)), ((), ())),
                             preferred_element_type=jnp.float32)          # (Cp, Cp)
    cp_ = ss.shape[0]
    rows = jax.lax.broadcasted_iota(jnp.int32, (cp_, cp_), 0)
    cols = jax.lax.broadcasted_iota(jnp.int32, (cp_, cp_), 1)
    # Identity restricted to the real clusters (padded diag entries stay 0).
    eye = jnp.logical_and(rows == cols, rows < num_clusters).astype(jnp.float32)
    inv_ss_norm = jax.lax.rsqrt(_sum_all(ss * ss))
    diff = ss * inv_ss_norm - eye * (1.0 / sqrt_c)
    ortho_loss = jnp.sqrt(_sum_all(diff * diff))

    # Cluster loss: ||sum_n S[n,:]||_2 / N * ||I||_F - 1.
    csize = jnp.sum(s, axis=0, keepdims=True)                             # (1, Cp)
    cluster_loss = (jnp.sqrt(jnp.sum(csize * csize, axis=1, keepdims=True))
                    * (sqrt_c / n_f) - 1.0)

    loss_ref[...] = spectral_loss + ortho_loss + cluster_loss


def fused_conv_layer(xp, adj, agg, p, *, num_nodes, num_clusters):
    g, n, dp = xp.shape
    cp = p["w2"].shape[1]

    def per_graph(shape):
        return pl.BlockSpec((None,) + shape, lambda i, _s=shape: (i,) + (0,) * len(_s))

    def shared(shape):
        return pl.BlockSpec(shape, lambda i, _s=shape: (0,) * len(_s))

    kernel = functools.partial(_conv_layer_kernel,
                               num_nodes=num_nodes, num_clusters=num_clusters)
    pooled, loss = pl.pallas_call(
        kernel,
        out_shape=(jax.ShapeDtypeStruct((g, cp, dp), jnp.float32),
                   jax.ShapeDtypeStruct((g, 1, 1), jnp.float32)),
        grid=(g,),
        in_specs=[per_graph((n, dp)), per_graph((n, n)), per_graph((n, n)),
                  per_graph((2 * dp, dp)), per_graph((1, dp)),
                  shared((2 * dp, dp)), shared((1, dp)),
                  per_graph((2 * dp, dp)), per_graph((1, dp)),
                  shared((dp, dp)), shared((1, dp)),
                  shared((dp, cp)), shared((1, cp))],
        out_specs=(per_graph((cp, dp)), per_graph((1, 1))),
        compiler_params=pltpu.CompilerParams(
            dimension_semantics=("parallel",)),   # one TC per graph on v7x
    )(xp, adj, agg, p["wa"], p["ba"], p["wco"], p["bco"], p["wb"], p["bb"],
      p["w1"], p["b1"], p["w2"], p["b2"])
    return pooled, loss


# ----------------------------------------------------------------------------
# Parameter init (deterministic, synthetic) with lane-padding / packing
# ----------------------------------------------------------------------------
def _init_sage_packed(key, dim, dp):
    k1, k2, k3 = jax.random.split(key, 3)
    wl = jax.random.normal(k1, (dim, dim), jnp.float32) * 0.1   # lin_l (out, in)
    bl = jax.random.normal(k2, (dim,), jnp.float32) * 0.01      # lin_l bias
    wr = jax.random.normal(k3, (dim, dim), jnp.float32) * 0.1   # lin_r, no bias
    wcat = jnp.zeros((2 * dp, dp), jnp.float32)
    wcat = wcat.at[:dim, :dim].set(wl.T).at[dp:dp + dim, :dim].set(wr.T)
    b = jnp.zeros((1, dp), jnp.float32).at[0, :dim].set(bl)
    return wcat, b


def _init_dmon_packed(key, dim, c, dp, cp):
    k1, k2, k3, k4 = jax.random.split(key, 4)
    w1 = jax.random.normal(k1, (dim, dim), jnp.float32) * 0.1
    b1 = jax.random.normal(k2, (dim,), jnp.float32) * 0.01
    w2 = jax.random.normal(k3, (c, dim), jnp.float32) * 0.1
    b2 = jax.random.normal(k4, (c,), jnp.float32) * 0.01
    w1p = jnp.zeros((dp, dp), jnp.float32).at[:dim, :dim].set(w1.T)
    b1p = jnp.zeros((1, dp), jnp.float32).at[0, :dim].set(b1)
    w2p = jnp.zeros((dp, cp), jnp.float32).at[:dim, :c].set(w2.T)
    # Padded cluster logits get -1e30 bias -> softmax mass exactly 0.
    b2p = jnp.full((1, cp), _NEG_INF, jnp.float32).at[0, :c].set(b2)
    return w1p, b1p, w2p, b2p


def init_conv_layer(key, dim, num_clusters):
    dp = _round_up(dim, _LANES)
    cp = _round_up(num_clusters, _LANES)
    keys = jax.random.split(key, 6)
    # TODO(synk): GraphNorm `co_norm` is constructed in __init__ but never used
    # in forward(), so it is intentionally omitted here.
    wa1, ba1 = _init_sage_packed(keys[0], dim, dp)   # conv1 (graph 0)
    wa2, ba2 = _init_sage_packed(keys[1], dim, dp)   # conv2 (graph 1)
    wco, bco = _init_sage_packed(keys[2], dim, dp)   # co_conv (shared)
    wb1, bb1 = _init_sage_packed(keys[3], dim, dp)   # conv3 (graph 0)
    wb2, bb2 = _init_sage_packed(keys[4], dim, dp)   # conv4 (graph 1)
    w1, b1, w2, b2 = _init_dmon_packed(keys[5], dim, num_clusters, dp, cp)
    return dict(
        wa=jnp.stack([wa1, wa2]), ba=jnp.stack([ba1, ba2]),
        wco=wco, bco=bco,
        wb=jnp.stack([wb1, wb2]), bb=jnp.stack([bb1, bb2]),
        w1=w1, b1=b1, w2=w2, b2=b2,
    )


# ----------------------------------------------------------------------------
# Plain-JAX glue: densification, padding, wrapper forward
# ----------------------------------------------------------------------------
def to_dense_adj(edge_index, num_nodes):
    src, dst = edge_index
    adj = jnp.zeros((num_nodes, num_nodes), jnp.float32)
    return adj.at[src, dst].add(1.0)


def mean_agg_matrix(adj):
    # agg[dst, src] = 1/in_deg(dst): PyG SAGEConv 'mean' aggregation at targets.
    a_t = adj.T
    deg = jnp.maximum(jnp.sum(a_t, axis=1, keepdims=True), 1.0)
    return a_t / deg


def conv_layer_forward(params, x1, x2, e1, e2, num_nodes, num_clusters):
    dim = x1.shape[1]
    dp = params["w1"].shape[0]

    adj1 = to_dense_adj(e1, num_nodes)
    adj2 = to_dense_adj(e2, num_nodes)
    agg1 = mean_agg_matrix(adj1)
    agg2 = mean_agg_matrix(adj2)

    # Batch the two graphs on a leading axis of size 2; pad features to 128 lanes.
    xp = jnp.zeros((2, num_nodes, dp), jnp.float32)
    xp = xp.at[0, :, :dim].set(x1).at[1, :, :dim].set(x2)
    adj = jnp.stack([adj1, adj2])
    agg = jnp.stack([agg1, agg2])

    pooled, loss = fused_conv_layer(xp, adj, agg, params,
                                    num_nodes=num_nodes,
                                    num_clusters=num_clusters)

    # Drop the padding, add to_dense_batch's batch dim of 1 and concat pooled
    # graphs on dim 1: (1, 2*k, dim).
    x = pooled[:, :num_clusters, :dim].reshape(1, 2 * num_clusters, dim)
    total_loss = jnp.sum(loss)        # sp1 + o1 + c1 + sp2 + o2 + c2
    return x, total_loss


if __name__ == "__main__":
    DIM = 32          # node feature dim
    NUM_NODES = 16    # graph nodes per graph
    NUM_CLUSTERS = 4  # `num_nodes` constructor arg of ConvLayer = DMoN cluster count

    key = jax.random.PRNGKey(0)
    kp, kx1, kx2 = jax.random.split(key, 3)
    params = init_conv_layer(kp, DIM, NUM_CLUSTERS)

    x1 = jax.random.normal(kx1, (NUM_NODES, DIM), jnp.float32)
    x2 = jax.random.normal(kx2, (NUM_NODES, DIM), jnp.float32)

    # Undirected ring graph (both directions, PyG edge_index convention).
    idx = jnp.arange(NUM_NODES, dtype=jnp.int32)
    nxt = (idx + 1) % NUM_NODES
    e1 = jnp.stack([jnp.concatenate([idx, nxt]),
                    jnp.concatenate([nxt, idx])])
    # Second graph: ring + skip-2 chords (still symmetric).
    skp = (idx + 2) % NUM_NODES
    e2 = jnp.stack([jnp.concatenate([idx, nxt, idx, skp]),
                    jnp.concatenate([nxt, idx, skp, idx])])

    fwd = jax.jit(conv_layer_forward, static_argnums=(5, 6))
    x, loss = fwd(params, x1, x2, e1, e2, NUM_NODES, NUM_CLUSTERS)
    jax.block_until_ready((x, loss))

    assert x.shape == (1, 2 * NUM_CLUSTERS, DIM), x.shape
    assert bool(jnp.isfinite(x).all()) and bool(jnp.isfinite(loss))
    print("KERNEL_OK")
</pallas_src>

<mosaic_0001>
module attributes {stable_mosaic.version = 11 : i64} {
  func.func private @main(%arg0: i32) attributes {dimension_semantics = [#tpu.dimension_semantics<core_parallel>], iteration_bounds = array<i64: 2>, tpu.core_type = #tpu.core_type<sc_scalar_subcore>, window_params = []} {
    return
  }
}

module attributes {stable_mosaic.version = 11 : i64} {
  func.func private @main(%arg0: i32) attributes {dimension_semantics = [#tpu.dimension_semantics<core_parallel>], iteration_bounds = array<i64: 2>, tpu.core_type = #tpu.core_type<sc_scalar_subcore>, window_params = []} {
    return
  }
}

module attributes {stable_mosaic.version = 11 : i64} {
  func.func @_conv_layer_kernel(%arg0: i32, %arg1: memref<1x16x128xf32, #tpu.memory_space<vmem>>, %arg2: memref<1x16x16xf32, #tpu.memory_space<vmem>>, %arg3: memref<1x16x16xf32, #tpu.memory_space<vmem>>, %arg4: memref<1x256x128xf32, #tpu.memory_space<vmem>>, %arg5: memref<1x1x128xf32, #tpu.memory_space<vmem>>, %arg6: memref<256x128xf32, #tpu.memory_space<vmem>>, %arg7: memref<1x128xf32, #tpu.memory_space<vmem>>, %arg8: memref<1x256x128xf32, #tpu.memory_space<vmem>>, %arg9: memref<1x1x128xf32, #tpu.memory_space<vmem>>, %arg10: memref<128x128xf32, #tpu.memory_space<vmem>>, %arg11: memref<1x128xf32, #tpu.memory_space<vmem>>, %arg12: memref<128x128xf32, #tpu.memory_space<vmem>>, %arg13: memref<1x128xf32, #tpu.memory_space<vmem>>, %arg14: memref<1x128x128xf32, #tpu.memory_space<vmem>>, %arg15: memref<1x1x1xf32, #tpu.memory_space<vmem>>) attributes {dimension_semantics = [#tpu.dimension_semantics<parallel>], iteration_bounds = array<i64: 2>, scalar_prefetch = 0 : i64, scratch_operands = 0 : i64, tpu.core_type = #tpu.core_type<tc>, window_params = [{transform_indices = @transform_0, window_bounds = array<i64: 1, 16, 128>}, {transform_indices = @transform_1, window_bounds = array<i64: 1, 16, 16>}, {transform_indices = @transform_2, window_bounds = array<i64: 1, 16, 16>}, {transform_indices = @transform_3, window_bounds = array<i64: 1, 256, 128>}, {transform_indices = @transform_4, window_bounds = array<i64: 1, 1, 128>}, {pipeline_mode = #tpu.pipeline_mode<synchronous>, transform_indices = @transform_5, window_bounds = array<i64: 256, 128>}, {pipeline_mode = #tpu.pipeline_mode<synchronous>, transform_indices = @transform_6, window_bounds = array<i64: 1, 128>}, {transform_indices = @transform_7, window_bounds = array<i64: 1, 256, 128>}, {transform_indices = @transform_8, window_bounds = array<i64: 1, 1, 128>}, {pipeline_mode = #tpu.pipeline_mode<synchronous>, transform_indices = @transform_9, window_bounds = array<i64: 128, 128>}, {pipeline_mode = #tpu.pipeline_mode<synchronous>, transform_indices = @transform_10, window_bounds = array<i64: 1, 128>}, {pipeline_mode = #tpu.pipeline_mode<synchronous>, transform_indices = @transform_11, window_bounds = array<i64: 128, 128>}, {pipeline_mode = #tpu.pipeline_mode<synchronous>, transform_indices = @transform_12, window_bounds = array<i64: 1, 128>}, {transform_indices = @transform_13, window_bounds = array<i64: 1, 128, 128>}, {transform_indices = @transform_14, window_bounds = array<i64: 1, 1, 1>}]} {
    %c0 = arith.constant 0 : index
    %c0_0 = arith.constant 0 : index
    %c0_1 = arith.constant 0 : index
    %0 = vector.load %arg1[%c0, %c0_0, %c0_1] : memref<1x16x128xf32, #tpu.memory_space<vmem>>, vector<1x16x128xf32>
    %1 = vector.shape_cast %0 : vector<1x16x128xf32> to vector<16x128xf32>
    %c0_2 = arith.constant 0 : index
    %c0_3 = arith.constant 0 : index
    %c0_4 = arith.constant 0 : index
    %2 = vector.load %arg2[%c0_2, %c0_3, %c0_4] : memref<1x16x16xf32, #tpu.memory_space<vmem>>, vector<1x16x16xf32>
    %3 = vector.shape_cast %2 : vector<1x16x16xf32> to vector<16x16xf32>
    %c0_5 = arith.constant 0 : index
    %c0_6 = arith.constant 0 : index
    %c0_7 = arith.constant 0 : index
    %4 = vector.load %arg3[%c0_5, %c0_6, %c0_7] : memref<1x16x16xf32, #tpu.memory_space<vmem>>, vector<1x16x16xf32>
    %5 = vector.shape_cast %4 : vector<1x16x16xf32> to vector<16x16xf32>
    %c0_8 = arith.constant 0 : index
    %c0_9 = arith.constant 0 : index
    %c0_10 = arith.constant 0 : index
    %6 = vector.load %arg4[%c0_8, %c0_9, %c0_10] : memref<1x256x128xf32, #tpu.memory_space<vmem>>, vector<1x256x128xf32>
    %7 = vector.shape_cast %6 : vector<1x256x128xf32> to vector<256x128xf32>
    %c0_11 = arith.constant 0 : index
    %c0_12 = arith.constant 0 : index
    %c0_13 = arith.constant 0 : index
    %8 = vector.load %arg5[%c0_11, %c0_12, %c0_13] : memref<1x1x128xf32, #tpu.memory_space<vmem>>, vector<1x1x128xf32>
    %9 = vector.shape_cast %8 : vector<1x1x128xf32> to vector<1x128xf32>
    %cst = arith.constant dense<0.000000e+00> : vector<16x128xf32>
    %10 = tpu.matmul %5, %1, %cst {dimension_numbers = #tpu.dot_dimension_numbers<[1], [0], [0], [1], [0, 0, 1, 1], [], []>} : vector<16x16xf32>, vector<16x128xf32>, vector<16x128xf32> -> vector<16x128xf32>
    %11 = tpu.concatenate %10, %1 in 1 : vector<16x128xf32>, vector<16x128xf32> -> vector<16x256xf32>
    %cst_14 = arith.constant dense<0.000000e+00> : vector<16x128xf32>
    %12 = tpu.matmul %11, %7, %cst_14 {dimension_numbers = #tpu.dot_dimension_numbers<[1], [0], [0], [1], [0, 0, 1, 1], [], []>} : vector<16x256xf32>, vector<256x128xf32>, vector<16x128xf32> -> vector<16x128xf32>
    %13 = vector.broadcast %9 : vector<1x128xf32> to vector<16x128xf32>
    %14 = arith.addf %12, %13 : vector<16x128xf32>
    %cst_15 = arith.constant 2.000000e+01 : f32
    %15 = vector.broadcast %cst_15 : f32 to vector<16x128xf32>
    %16 = arith.cmpf ogt, %14, %15 : vector<16x128xf32>
    %cst_16 = arith.constant 2.000000e+01 : f32
    %17 = vector.broadcast %cst_16 : f32 to vector<16x128xf32>
    %18 = arith.minimumf %14, %17 : vector<16x128xf32>
    %19 = math.exp %18 : vector<16x128xf32>
    %cst_17 = arith.constant 1.000000e+00 : f32
    %20 = vector.broadcast %cst_17 : f32 to vector<16x128xf32>
    %21 = arith.addf %20, %19 : vector<16x128xf32>
    %22 = math.log %21 : vector<16x128xf32>
    %23 = arith.select %16, %14, %22 : vector<16x128xi1>, vector<16x128xf32>
    %24 = math.tanh %23 : vector<16x128xf32>
    %25 = arith.mulf %14, %24 : vector<16x128xf32>
    %c0_18 = arith.constant 0 : index
    %c0_19 = arith.constant 0 : index
    %26 = vector.load %arg6[%c0_18, %c0_19] : memref<256x128xf32, #tpu.memory_space<vmem>>, vector<256x128xf32>
    %c0_20 = arith.constant 0 : index
    %c0_21 = arith.constant 0 : index
    %27 = vector.load %arg7[%c0_20, %c0_21] : memref<1x128xf32, #tpu.memory_space<vmem>>, vector<1x128xf32>
    %cst_22 = arith.constant dense<0.000000e+00> : vector<16x128xf32>
    %28 = tpu.matmul %5, %25, %cst_22 {dimension_numbers = #tpu.dot_dimension_numbers<[1], [0], [0], [1], [0, 0, 1, 1], [], []>} : vector<16x16xf32>, vector<16x128xf32>, vector<16x128xf32> -> vector<16x128xf32>
    %29 = tpu.concatenate %28, %25 in 1 : vector<16x128xf32>, vector<16x128xf32> -> vector<16x256xf32>
    %cst_23 = arith.constant dense<0.000000e+00> : vector<16x128xf32>
    %30 = tpu.matmul %29, %26, %cst_23 {dimension_numbers = #tpu.dot_dimension_numbers<[1], [0], [0], [1], [0, 0, 1, 1], [], []>} : vector<16x256xf32>, vector<256x128xf32>, vector<16x128xf32> -> vector<16x128xf32>
    %31 = vector.broadcast %27 : vector<1x128xf32> to vector<16x128xf32>
    %32 = arith.addf %30, %31 : vector<16x128xf32>
    %cst_24 = arith.constant 2.000000e+01 : f32
    %33 = vector.broadcast %cst_24 : f32 to vector<16x128xf32>
    %34 = arith.cmpf ogt, %32, %33 : vector<16x128xf32>
    %cst_25 = arith.constant 2.000000e+01 : f32
    %35 = vector.broadcast %cst_25 : f32 to vector<16x128xf32>
    %36 = arith.minimumf %32, %35 : vector<16x128xf32>
    %37 = math.exp %36 : vector<16x128xf32>
    %cst_26 = arith.constant 1.000000e+00 : f32
    %38 = vector.broadcast %cst_26 : f32 to vector<16x128xf32>
    %39 = arith.addf %38, %37 : vector<16x128xf32>
    %40 = math.log %39 : vector<16x128xf32>
    %41 = arith.select %34, %32, %40 : vector<16x128xi1>, vector<16x128xf32>
    %42 = math.tanh %41 : vector<16x128xf32>
    %43 = arith.mulf %32, %42 : vector<16x128xf32>
    %44 = arith.addf %25, %43 : vector<16x128xf32>
    %c0_27 = arith.constant 0 : index
    %c0_28 = arith.constant 0 : index
    %c0_29 = arith.constant 0 : index
    %45 = vector.load %arg8[%c0_27, %c0_28, %c0_29] : memref<1x256x128xf32, #tpu.memory_space<vmem>>, vector<1x256x128xf32>
    %46 = vector.shape_cast %45 : vector<1x256x128xf32> to vector<256x128xf32>
    %c0_30 = arith.constant 0 : index
    %c0_31 = arith.constant 0 : index
    %c0_32 = arith.constant 0 : index
    %47 = vector.load %arg9[%c0_30, %c0_31, %c0_32] : memref<1x1x128xf32, #tpu.memory_space<vmem>>, vector<1x1x128xf32>
    %48 = vector.shape_cast %47 : vector<1x1x128xf32> to vector<1x128xf32>
    %cst_33 = arith.constant dense<0.000000e+00> : vector<16x128xf32>
    %49 = tpu.matmul %5, %44, %cst_33 {dimension_numbers = #tpu.dot_dimension_numbers<[1], [0], [0], [1], [0, 0, 1, 1], [], []>} : vector<16x16xf32>, vector<16x128xf32>, vector<16x128xf32> -> vector<16x128xf32>
    %50 = tpu.concatenate %49, %44 in 1 : vector<16x128xf32>, vector<16x128xf32> -> vector<16x256xf32>
    %cst_34 = arith.constant dense<0.000000e+00> : vector<16x128xf32>
    %51 = tpu.matmul %50, %46, %cst_34 {dimension_numbers = #tpu.dot_dimension_numbers<[1], [0], [0], [1], [0, 0, 1, 1], [], []>} : vector<16x256xf32>, vector<256x128xf32>, vector<16x128xf32> -> vector<16x128xf32>
    %52 = vector.broadcast %48 : vector<1x128xf32> to vector<16x128xf32>
    %53 = arith.addf %51, %52 : vector<16x128xf32>
    %cst_35 = arith.constant 2.000000e+01 : f32
    %54 = vector.broadcast %cst_35 : f32 to vector<16x128xf32>
    %55 = arith.cmpf ogt, %53, %54 : vector<16x128xf32>
    %cst_36 = arith.constant 2.000000e+01 : f32
    %56 = vector.broadcast %cst_36 : f32 to vector<16x128xf32>
    %57 = arith.minimumf %53, %56 : vector<16x128xf32>
    %58 = math.exp %57 : vector<16x128xf32>
    %cst_37 = arith.constant 1.000000e+00 : f32
    %59 = vector.broadcast %cst_37 : f32 to vector<16x128xf32>
    %60 = arith.addf %59, %58 : vector<16x128xf32>
    %61 = math.log %60 : vector<16x128xf32>
    %62 = arith.select %55, %53, %61 : vector<16x128xi1>, vector<16x128xf32>
    %63 = math.tanh %62 : vector<16x128xf32>
    %64 = arith.mulf %53, %63 : vector<16x128xf32>
    %c0_38 = arith.constant 0 : index
    %c0_39 = arith.constant 0 : index
    %65 = vector.load %arg10[%c0_38, %c0_39] : memref<128x128xf32, #tpu.memory_space<vmem>>, vector<128x128xf32>
    %cst_40 = arith.constant dense<0.000000e+00> : vector<16x128xf32>
    %66 = tpu.matmul %64, %65, %cst_40 {dimension_numbers = #tpu.dot_dimension_numbers<[1], [0], [0], [1], [0, 0, 1, 1], [], []>} : vector<16x128xf32>, vector<128x128xf32>, vector<16x128xf32> -> vector<16x128xf32>
    %c0_41 = arith.constant 0 : index
    %c0_42 = arith.constant 0 : index
    %67 = vector.load %arg11[%c0_41, %c0_42] : memref<1x128xf32, #tpu.memory_space<vmem>>, vector<1x128xf32>
    %68 = vector.broadcast %67 : vector<1x128xf32> to vector<16x128xf32>
    %69 = arith.addf %66, %68 : vector<16x128xf32>
    %c0_43 = arith.constant 0 : index
    %c0_44 = arith.constant 0 : index
    %70 = vector.load %arg12[%c0_43, %c0_44] : memref<128x128xf32, #tpu.memory_space<vmem>>, vector<128x128xf32>
    %cst_45 = arith.constant dense<0.000000e+00> : vector<16x128xf32>
    %71 = tpu.matmul %69, %70, %cst_45 {dimension_numbers = #tpu.dot_dimension_numbers<[1], [0], [0], [1], [0, 0, 1, 1], [], []>} : vector<16x128xf32>, vector<128x128xf32>, vector<16x128xf32> -> vector<16x128xf32>
    %c0_46 = arith.constant 0 : index
    %c0_47 = arith.constant 0 : index
    %72 = vector.load %arg13[%c0_46, %c0_47] : memref<1x128xf32, #tpu.memory_space<vmem>>, vector<1x128xf32>
    %73 = vector.broadcast %72 : vector<1x128xf32> to vector<16x128xf32>
    %74 = arith.addf %71, %73 : vector<16x128xf32>
    %cst_48 = arith.constant dense<0xFF800000> : vector<16xf32>
    %75 = vector.multi_reduction <maximumf>, %74, %cst_48 [1] : vector<16x128xf32> to vector<16xf32>
    %76 = vector.shape_cast %75 : vector<16xf32> to vector<16x1xf32>
    %77 = vector.broadcast %76 : vector<16x1xf32> to vector<16x128xf32>
    %78 = arith.subf %74, %77 : vector<16x128xf32>
    %79 = math.exp %78 : vector<16x128xf32>
    %cst_49 = arith.constant dense<0.000000e+00> : vector<16xf32>
    %80 = vector.multi_reduction <add>, %79, %cst_49 [1] : vector<16x128xf32> to vector<16xf32>
    %81 = vector.shape_cast %80 : vector<16xf32> to vector<16x1xf32>
    %82 = tpu.reciprocal %81 {approx = true} : vector<16x1xf32> -> vector<16x1xf32>
    %83 = vector.broadcast %82 : vector<16x1xf32> to vector<16x128xf32>
    %84 = arith.mulf %79, %83 : vector<16x128xf32>
    %cst_50 = arith.constant dense<0.000000e+00> : vector<128x128xf32>
    %85 = tpu.matmul %84, %64, %cst_50 {dimension_numbers = #tpu.dot_dimension_numbers<[0], [0], [1], [1], [0, 1, 1, 1], [], []>} : vector<16x128xf32>, vector<16x128xf32>, vector<128x128xf32> -> vector<128x128xf32>
    %cst_51 = arith.constant 0.000000e+00 : f32
    %86 = vector.broadcast %cst_51 : f32 to vector<128x128xf32>
    %87 = arith.cmpf ogt, %85, %86 : vector<128x128xf32>
    %88 = math.exp %85 : vector<128x128xf32>
    %cst_52 = arith.constant 1.000000e+00 : f32
    %89 = vector.broadcast %cst_52 : f32 to vector<128x128xf32>
    %90 = arith.subf %88, %89 : vector<128x128xf32>
    %cst_53 = arith.constant 1.67326319 : f32
    %91 = vector.broadcast %cst_53 : f32 to vector<128x128xf32>
    %92 = arith.mulf %91, %90 : vector<128x128xf32>
    %93 = arith.select %87, %85, %92 : vector<128x128xi1>, vector<128x128xf32>
    %cst_54 = arith.constant 1.05070102 : f32
    %94 = vector.broadcast %cst_54 : f32 to vector<128x128xf32>
    %95 = arith.mulf %94, %93 : vector<128x128xf32>
    %c0_55 = arith.constant 0 : index
    %c0_56 = arith.constant 0 : index
    %c0_57 = arith.constant 0 : index
    %96 = vector.load %arg14[%c0_55, %c0_56, %c0_57] : memref<1x128x128xf32, #tpu.memory_space<vmem>>, vector<1x128x128xf32>
    %97 = vector.shape_cast %96 : vector<1x128x128xf32> to vector<128x128xf32>
    %98 = vector.shape_cast %95 : vector<128x128xf32> to vector<1x128x128xf32>
    tpu.vector_store %arg14[%c0_55, %c0_56, %c0_57], %98 {strides = array<i32>} : memref<1x128x128xf32, #tpu.memory_space<vmem>>, vector<1x128x128xf32>,
    %cst_58 = arith.constant dense<0.000000e+00> : vector<16x128xf32>
    %99 = tpu.matmul %3, %84, %cst_58 {dimension_numbers = #tpu.dot_dimension_numbers<[1], [0], [0], [1], [0, 0, 1, 1], [], []>} : vector<16x16xf32>, vector<16x128xf32>, vector<16x128xf32> -> vector<16x128xf32>
    %100 = arith.mulf %84, %99 : vector<16x128xf32>
    %cst_59 = arith.constant dense<0.000000e+00> : vector<16xf32>
    %101 = vector.multi_reduction <add>, %100, %cst_59 [1] : vector<16x128xf32> to vector<16xf32>
    %102 = vector.shape_cast %101 : vector<16xf32> to vector<16x1xf32>
    %cst_60 = arith.constant dense<0.000000e+00> : vector<1xf32>
    %103 = vector.multi_reduction <add>, %102, %cst_60 [0] : vector<16x1xf32> to vector<1xf32>
    %104 = vector.shape_cast %103 : vector<1xf32> to vector<1x1xf32>
    %cst_61 = arith.constant dense<0.000000e+00> : vector<16xf32>
    %105 = vector.multi_reduction <add>, %3, %cst_61 [0] : vector<16x16xf32> to vector<16xf32>
    %106 = vector.shape_cast %105 : vector<16xf32> to vector<1x16xf32>
    %cst_62 = arith.constant dense<0.000000e+00> : vector<1xf32>
    %107 = vector.multi_reduction <add>, %106, %cst_62 [1] : vector<1x16xf32> to vector<1xf32>
    %108 = vector.shape_cast %107 : vector<1xf32> to vector<1x1xf32>
    %cst_63 = arith.constant 5.000000e-01 : f32
    %109 = vector.broadcast %cst_63 : f32 to vector<1x1xf32>
    %110 = arith.mulf %109, %108 : vector<1x1xf32>
    %cst_64 = arith.constant 2.000000e+00 : f32
    %111 = vector.broadcast %cst_64 : f32 to vector<1x1xf32>
    %112 = arith.mulf %111, %110 : vector<1x1xf32>
    %113 = tpu.reciprocal %112 {approx = true} : vector<1x1xf32> -> vector<1x1xf32>
    %cst_65 = arith.constant dense<0.000000e+00> : vector<1x128xf32>
    %114 = tpu.matmul %106, %84, %cst_65 {dimension_numbers = #tpu.dot_dimension_numbers<[1], [0], [0], [1], [0, 0, 1, 1], [], []>} : vector<1x16xf32>, vector<16x128xf32>, vector<1x128xf32> -> vector<1x128xf32>
    %115 = arith.mulf %114, %114 : vector<1x128xf32>
    %cst_66 = arith.constant dense<0.000000e+00> : vector<1xf32>
    %116 = vector.multi_reduction <add>, %115, %cst_66 [1] : vector<1x128xf32> to vector<1xf32>
    %117 = vector.shape_cast %116 : vector<1xf32> to vector<1x1xf32>
    %118 = arith.mulf %117, %113 : vector<1x1xf32>
    %119 = arith.subf %104, %118 : vector<1x1xf32>
    %cst_67 = arith.constant 0.000000e+00 : f32
    %120 = vector.broadcast %cst_67 : f32 to vector<1x1xf32>
    %121 = arith.subf %120, %119 : vector<1x1xf32>
    %122 = arith.mulf %121, %113 : vector<1x1xf32>
    %cst_68 = arith.constant dense<0.000000e+00> : vector<128x128xf32>
    %123 = tpu.matmul %84, %84, %cst_68 {dimension_numbers = #tpu.dot_dimension_numbers<[0], [0], [1], [1], [0, 1, 1, 1], [], []>} : vector<16x128xf32>, vector<16x128xf32>, vector<128x128xf32> -> vector<128x128xf32>
    %124 = tpu.iota {dimensions = array<i32: 0>} : vector<128x128xi32>
    %125 = tpu.iota {dimensions = array<i32: 1>} : vector<128x128xi32>
    %126 = arith.cmpi eq, %124, %125 : vector<128x128xi32>
    %c4_i32 = arith.constant 4 : i32
    %127 = vector.broadcast %c4_i32 : i32 to vector<128x128xi32>
    %128 = arith.cmpi slt, %124, %127 : vector<128x128xi32>
    %129 = arith.andi %126, %128 : vector<128x128xi1>
    %130 = arith.extui %129 : vector<128x128xi1> to vector<128x128xi32>
    %131 = arith.sitofp %130 : vector<128x128xi32> to vector<128x128xf32>
    %132 = arith.mulf %123, %123 : vector<128x128xf32>
    %cst_69 = arith.constant dense<0.000000e+00> : vector<128xf32>
    %133 = vector.multi_reduction <add>, %132, %cst_69 [1] : vector<128x128xf32> to vector<128xf32>
    %134 = vector.shape_cast %133 : vector<128xf32> to vector<128x1xf32>
    %cst_70 = arith.constant dense<0.000000e+00> : vector<1xf32>
    %135 = vector.multi_reduction <add>, %134, %cst_70 [0] : vector<128x1xf32> to vector<1xf32>
    %136 = vector.shape_cast %135 : vector<1xf32> to vector<1x1xf32>
    %137 = math.rsqrt %136 : vector<1x1xf32>
    %138 = vector.broadcast %137 : vector<1x1xf32> to vector<128x128xf32>
    %139 = arith.mulf %123, %138 : vector<128x128xf32>
    %cst_71 = arith.constant 5.000000e-01 : f32
    %140 = vector.broadcast %cst_71 : f32 to vector<128x128xf32>
    %141 = arith.mulf %131, %140 : vector<128x128xf32>
    %142 = arith.subf %139, %141 : vector<128x128xf32>
    %143 = arith.mulf %142, %142 : vector<128x128xf32>
    %cst_72 = arith.constant dense<0.000000e+00> : vector<128xf32>
    %144 = vector.multi_reduction <add>, %143, %cst_72 [1] : vector<128x128xf32> to vector<128xf32>
    %145 = vector.shape_cast %144 : vector<128xf32> to vector<128x1xf32>
    %cst_73 = arith.constant dense<0.000000e+00> : vector<1xf32>
    %146 = vector.multi_reduction <add>, %145, %cst_73 [0] : vector<128x1xf32> to vector<1xf32>
    %147 = vector.shape_cast %146 : vector<1xf32> to vector<1x1xf32>
    %148 = math.sqrt %147 : vector<1x1xf32>
    %cst_74 = arith.constant dense<0.000000e+00> : vector<128xf32>
    %149 = vector.multi_reduction <add>, %84, %cst_74 [0] : vector<16x128xf32> to vector<128xf32>
    %150 = vector.shape_cast %149 : vector<128xf32> to vector<1x128xf32>
    %151 = arith.mulf %150, %150 : vector<1x128xf32>
    %cst_75 = arith.constant dense<0.000000e+00> : vector<1xf32>
    %152 = vector.multi_reduction <add>, %151, %cst_75 [1] : vector<1x128xf32> to vector<1xf32>
    %153 = vector.shape_cast %152 : vector<1xf32> to vector<1x1xf32>
    %154 = math.sqrt %153 : vector<1x1xf32>
    %cst_76 = arith.constant 1.250000e-01 : f32
    %155 = vector.broadcast %cst_76 : f32 to vector<1x1xf32>
    %156 = arith.mulf %154, %155 : vector<1x1xf32>
    %cst_77 = arith.constant 1.000000e+00 : f32
    %157 = vector.broadcast %cst_77 : f32 to vector<1x1xf32>
    %158 = arith.subf %156, %157 : vector<1x1xf32>
    %159 = arith.addf %122, %148 : vector<1x1xf32>
    %160 = arith.addf %159, %158 : vector<1x1xf32>
    %c0_78 = arith.constant 0 : index
    %c0_79 = arith.constant 0 : index
    %c0_80 = arith.constant 0 : index
    %161 = vector.load %arg15[%c0_78, %c0_79, %c0_80] : memref<1x1x1xf32, #tpu.memory_space<vmem>>, vector<1x1x1xf32>
    %162 = vector.shape_cast %161 : vector<1x1x1xf32> to vector<1x1xf32>
    %163 = vector.shape_cast %160 : vector<1x1xf32> to vector<1x1x1xf32>
    tpu.vector_store %arg15[%c0_78, %c0_79, %c0_80], %163 {strides = array<i32>} : memref<1x1x1xf32, #tpu.memory_space<vmem>>, vector<1x1x1xf32>,
    return
  }
  func.func @transform_0(%arg0: i32) -> (i32, i32, i32) {
    %c0_i32 = arith.constant 0 : i32
    %c0_i32_0 = arith.constant 0 : i32
    %c0_i32_1 = arith.constant 0 : i32
    return %arg0, %c0_i32, %c0_i32_0 : i32, i32, i32
  }
  func.func @transform_1(%arg0: i32) -> (i32, i32, i32) {
    %c0_i32 = arith.constant 0 : i32
    %c0_i32_0 = arith.constant 0 : i32
    %c0_i32_1 = arith.constant 0 : i32
    return %arg0, %c0_i32, %c0_i32_0 : i32, i32, i32
  }
  func.func @transform_2(%arg0: i32) -> (i32, i32, i32) {
    %c0_i32 = arith.constant 0 : i32
    %c0_i32_0 = arith.constant 0 : i32
    %c0_i32_1 = arith.constant 0 : i32
    return %arg0, %c0_i32, %c0_i32_0 : i32, i32, i32
  }
  func.func @transform_3(%arg0: i32) -> (i32, i32, i32) {
    %c0_i32 = arith.constant 0 : i32
    %c0_i32_0 = arith.constant 0 : i32
    %c0_i32_1 = arith.constant 0 : i32
    return %arg0, %c0_i32, %c0_i32_0 : i32, i32, i32
  }
  func.func @transform_4(%arg0: i32) -> (i32, i32, i32) {
    %c0_i32 = arith.constant 0 : i32
    %c0_i32_0 = arith.constant 0 : i32
    %c0_i32_1 = arith.constant 0 : i32
    return %arg0, %c0_i32, %c0_i32_0 : i32, i32, i32
  }
  func.func @transform_5(%arg0: i32) -> (i32, i32) {
    %c0_i32 = arith.constant 0 : i32
    %c0_i32_0 = arith.constant 0 : i32
    %c0_i32_1 = arith.constant 0 : i32
    return %c0_i32, %c0_i32_0 : i32, i32
  }
  func.func @transform_6(%arg0: i32) -> (i32, i32) {
    %c0_i32 = arith.constant 0 : i32
    %c0_i32_0 = arith.constant 0 : i32
    %c0_i32_1 = arith.constant 0 : i32
    return %c0_i32, %c0_i32_0 : i32, i32
  }
  func.func @transform_7(%arg0: i32) -> (i32, i32, i32) {
    %c0_i32 = arith.constant 0 : i32
    %c0_i32_0 = arith.constant 0 : i32
    %c0_i32_1 = arith.constant 0 : i32
    return %arg0, %c0_i32, %c0_i32_0 : i32, i32, i32
  }
  func.func @transform_8(%arg0: i32) -> (i32, i32, i32) {
    %c0_i32 = arith.constant 0 : i32
    %c0_i32_0 = arith.constant 0 : i32
    %c0_i32_1 = arith.constant 0 : i32
    return %arg0, %c0_i32, %c0_i32_0 : i32, i32, i32
  }
  func.func @transform_9(%arg0: i32) -> (i32, i32) {
    %c0_i32 = arith.constant 0 : i32
    %c0_i32_0 = arith.constant 0 : i32
    %c0_i32_1 = arith.constant 0 : i32
    return %c0_i32, %c0_i32_0 : i32, i32
  }
  func.func @transform_10(%arg0: i32) -> (i32, i32) {
    %c0_i32 = arith.constant 0 : i32
    %c0_i32_0 = arith.constant 0 : i32
    %c0_i32_1 = arith.constant 0 : i32
    return %c0_i32, %c0_i32_0 : i32, i32
  }
  func.func @transform_11(%arg0: i32) -> (i32, i32) {
    %c0_i32 = arith.constant 0 : i32
    %c0_i32_0 = arith.constant 0 : i32
    %c0_i32_1 = arith.constant 0 : i32
    return %c0_i32, %c0_i32_0 : i32, i32
  }
  func.func @transform_12(%arg0: i32) -> (i32, i32) {
    %c0_i32 = arith.constant 0 : i32
    %c0_i32_0 = arith.constant 0 : i32
    %c0_i32_1 = arith.constant 0 : i32
    return %c0_i32, %c0_i32_0 : i32, i32
  }
  func.func @transform_13(%arg0: i32) -> (i32, i32, i32) {
    %c0_i32 = arith.constant 0 : i32
    %c0_i32_0 = arith.constant 0 : i32
    %c0_i32_1 = arith.constant 0 : i32
    return %arg0, %c0_i32, %c0_i32_0 : i32, i32, i32
  }
  func.func @transform_14(%arg0: i32) -> (i32, i32, i32) {
    %c0_i32 = arith.constant 0 : i32
    %c0_i32_0 = arith.constant 0 : i32
    %c0_i32_1 = arith.constant 0 : i32
    return %arg0, %c0_i32, %c0_i32_0 : i32, i32, i32
  }
}

</mosaic_0001>

<bundles_post_ra>
// kernel: conv_layer_forward.1
= control target key start
LH: loop header
LB: loop body
LE: loop exit
PB: predicated region body
PF: predicated region fallthrough
CT: control target
= control target key end

     0   :  { %s3417_s29 = smov 0   ;;  %s3925_s0 = inlined_call_operand.vmem [shape: f32[2,16,128], index: 0, kind: input, shape index: {}]   ;;  %s3926_s1 = inlined_call_operand.vmem [shape: f32[2,16,16], index: 1, kind: input, shape index: {}]   ;;  %s3927_s2 = inlined_call_operand.vmem [shape: f32[2,16,16], index: 2, kind: input, shape index: {}]   ;;  %s3928_s3 = inlined_call_operand.vmem [shape: f32[2,256,128], index: 3, kind: input, shape index: {}]   ;;  %s3929_s4 = inlined_call_operand.vmem [shape: f32[2,1,128], index: 4, kind: input, shape index: {}]   ;;  %s3930_s5 = inlined_call_operand.vmem [shape: f32[256,128], index: 5, kind: input, shape index: {}]   ;;  %s3931_s6 = inlined_call_operand.vmem [shape: f32[1,128], index: 6, kind: input, shape index: {}]   ;;  %s3932_s7 = inlined_call_operand.vmem [shape: f32[2,256,128], index: 7, kind: input, shape index: {}]   ;;  %s3933_s8 = inlined_call_operand.vmem [shape: f32[2,1,128], index: 8, kind: input, shape index: {}]   ;;  %s3934_s9 = inlined_call_operand.vmem [shape: f32[128,128], index: 9, kind: input, shape index: {}]   ;;  %s3935_s10 = inlined_call_operand.vmem [shape: f32[1,128], index: 10, kind: input, shape index: {}]   ;;  %s3936_s11 = inlined_call_operand.vmem [shape: f32[128,128], index: 11, kind: input, shape index: {}]   ;;  %s3937_s12 = inlined_call_operand.vmem [shape: f32[1,128], index: 12, kind: input, shape index: {}]   ;;  %s3938_s13 = inlined_call_operand.vmem [shape: f32[2,128,128], index: 13, kind: output, shape index: {0}]   ;;  %s3939_s14 = inlined_call_operand.vmem [shape: f32[2,1,1], index: 14, kind: output, shape index: {1}]  }
   0x1 LB: > { %s2592_s30 = sadd.s32 4294967295, %s3337_s29   ;;  %p2596_p0 = scmp.ge.s32.totalorder %s3337_s29, 1  ;;  %s3337_s29 = sphi %s3417_s29, %s25_s29  }
   0x2   : > { %p471_p1 = scmp.lt.s32.totalorder %s3337_s29, 3 }
   0x4   : > { %p472_p2 = pnand %p2596_p0, %p471_p1 }
   0x5   : > { %p546_p3 = scmp.lt.s32.totalorder (!%p472_p2), %s2592_s30, 1  ;;  %vm624_vm0 = vcmask (!%p472_p2), 130048   ;;  %vm3340_vm7 = vmmov (!%p472_p2), 0  }
   0x6   : > { %475 = sbr.rel (%p472_p2) target bundleno = 3060 (0xbf4), region = 72 }
   0xd   : > { %s3941_s30 = smov (!%p546_p3, %s2592_s30), 1 }
   0xe   : > { %s3428_s15 = sshll.u32 %s3941_s30, 4  ;;  %s2678_s16 = sshll.u32 %s3941_s30, 8 }
   0xf   : > { %s550_s19 = scalar_lea.vmem %s3925_s0, %s3428_s15  ;;  %s3440_s22 = scalar_lea.vmem %s3928_s3, %s2678_s16 }
  0x10   : > { %v585_v0 = vld [vmem:[%s550_s19] sm:$0xff]  ;;  %v3442_v1 = vld [vmem:[%s550_s19 + $0x8] sm:$0xff]  ;;  %s560_s25 = scalar_lea.vmem %s3927_s2, %s3428_s15  ;;  %v609_v10 = vld [vmem:[%s3440_s22 + $0x90] sm:$0xff]  ;;  %s568_s28 = scalar_lea.vmem %s3929_s4, %s3941_s30 }
  0x11   : > { %v607_v2 = vld [vmem:[%s3440_s22 + $0x80] sm:$0xff]  ;;  %v3047_v3 = vpack.c.bf16 %v3442_v1, %v585_v0  ;;  %v608_v4 = vld [vmem:[%s3440_s22 + $0x88] sm:$0xff]  ;;  %776 = vmatprep.mubr.f32.mxu1 %v585_v0  ;;  %v610_v11 = vld [vmem:[%s3440_s22 + $0x98] sm:$0xff]  ;;  %s3609_s23 = scalar_lea.vmem %s3932_s7, %s2678_s16  ;;  %s555_s21 = scalar_lea.vmem %s3926_s1, %s3428_s15 }
  0x12   : > { %v591_v5 = vld [vmem:[%s3440_s22] sm:$0xff]  ;;  %v592_v6 = vld [vmem:[%s3440_s22 + $0x8] sm:$0xff]  ;;  %v3051_v8 = vpack.c.bf16 %v608_v4, %v607_v2  ;;  %v593_v12 = vld [vmem:[%s3440_s22 + $0x10] sm:$0xff]  ;;  %v3055_v15 = vpack.c.bf16 %v610_v11, %v609_v10  ;;  %s2680_s15 = sshll.u32 %s3941_s30, 7  ;;  %s584_s26 = scalar_lea.vmem %s3939_s14, %s3941_s30 }
  0x13   : > { %v3453_v7 = vld [vmem:[%s560_s25] sm:$0xff]  ;;  %v3053_v9 = vpack.c.bf16 %v592_v6, %v591_v5  ;;  %3048 = vmatprep.subr.bf16.mxu0 %v3047_v3  ;;  %v594_v13 = vld [vmem:[%s3440_s22 + $0x18] sm:$0xff]  ;;  %v3461_v14 = vld [vmem:[%s560_s25 + $0x8] sm:$0xff]  ;;  %s3837_s16 = scalar_lea.vmem %s3938_s13, %s2680_s15 }
  0x14   : > { %2890 = vmatprep.mubr.msk.f32.mxu0 %vm624_vm0, %v3453_v7  ;;  %3050 = vmatpush3.bf16.msra.mxu0 %v3047_v3  ;;  %v611_v16 = vld [vmem:[%s3440_s22 + $0xa0] sm:$0xff]  ;;  %v612_v17 = vld [vmem:[%s3440_s22 + $0xa8] sm:$0xff]  ;;  %v3057_v18 = vpack.c.bf16 %v594_v13, %v593_v12  ;;  %v613_v22 = vld [vmem:[%s3440_s22 + $0xb0] sm:$0xff] }
  0x15   : > { %3052 = vmatprep.subr.bf16.mxu1 %v3051_v8  ;;  %v3059_v19 = vpack.c.bf16 %v612_v17, %v611_v16  ;;  %v595_v20 = vld [vmem:[%s3440_s22 + $0x20] sm:$0xff]  ;;  %v596_v21 = vld [vmem:[%s3440_s22 + $0x28] sm:$0xff]  ;;  %v614_v23 = vld [vmem:[%s3440_s22 + $0xb8] sm:$0xff] }
  0x16   : > { %3054 = vmatpush3.bf16.msra.mxu1 %v3053_v9  ;;  %v3061_v24 = vpack.c.bf16 %v596_v21, %v595_v20  ;;  %v3063_v25 = vpack.c.bf16 %v614_v23, %v613_v22  ;;  %v597_v26 = vld [vmem:[%s3440_s22 + $0x30] sm:$0xff]  ;;  %v598_v27 = vld [vmem:[%s3440_s22 + $0x38] sm:$0xff]  ;;  %v615_v28 = vld [vmem:[%s3440_s22 + $0xc0] sm:$0xff] }
  0x17   : > { %3056 = vmatprep.subr.bf16.mxu1 %v3055_v15  ;;  %2891 = vmatmul.mubr.msk.f32.vlgmr.msra.gmra.mrb[0].mxu0 %vm624_vm0, %v3461_v14  ;;  %v616_v29 = vld [vmem:[%s3440_s22 + $0xc8] sm:$0xff]  ;;  %v3065_v30 = vpack.c.bf16 %v598_v27, %v597_v26  ;;  %v599_v32 = vld [vmem:[%s3440_s22 + $0x40] sm:$0xff]  ;;  %v617_v34 = vld [vmem:[%s3440_s22 + $0xd0] sm:$0xff] }
  0x18   : > { %2897 = vmatprep.mubr.msk.f32.mxu0 %vm624_vm0, %v3453_v7  ;;  %v3067_v31 = vpack.c.bf16 %v616_v29, %v615_v28  ;;  %v600_v33 = vld [vmem:[%s3440_s22 + $0x48] sm:$0xff]  ;;  %v618_v35 = vld [vmem:[%s3440_s22 + $0xd8] sm:$0xff]  ;;  %v601_v38 = vld [vmem:[%s3440_s22 + $0x50] sm:$0xff] }
  0x19   : > { %v3069_v36 = vpack.c.bf16 %v600_v33, %v599_v32  ;;  %v3071_v37 = vpack.c.bf16 %v618_v35, %v617_v34  ;;  %v602_v39 = vld [vmem:[%s3440_s22 + $0x58] sm:$0xff]  ;;  %v619_v40 = vld [vmem:[%s3440_s22 + $0xe0] sm:$0xff]  ;;  %v620_v41 = vld [vmem:[%s3440_s22 + $0xe8] sm:$0xff] }
  0x1a   : > { %3058 = vmatpush3.bf16.msra.mxu1 %v3057_v18  ;;  %v3073_v42 = vpack.c.bf16 %v602_v39, %v601_v38  ;;  %v3075_v43 = vpack.c.bf16 %v620_v41, %v619_v40  ;;  %v603_v44 = vld [vmem:[%s3440_s22 + $0x60] sm:$0xff]  ;;  %v604_v45 = vld [vmem:[%s3440_s22 + $0x68] sm:$0xff]  ;;  %v621_v46 = vld [vmem:[%s3440_s22 + $0xf0] sm:$0xff] }
  0x1b   : > { %3060 = vmatprep.subr.bf16.mxu1 %v3059_v19  ;;  %v622_v47 = vld [vmem:[%s3440_s22 + $0xf8] sm:$0xff]  ;;  %v3077_v48 = vpack.c.bf16 %v604_v45, %v603_v44  ;;  %v605_v50 = vld [vmem:[%s3440_s22 + $0x70] sm:$0xff]  ;;  %v2611_v56 = vld [vmem:[%s568_s28] ss:$0 sm:$0xff] }
  0x1c   : > { %v3079_v49 = vpack.c.bf16 %v622_v47, %v621_v46  ;;  %v606_v51 = vld [vmem:[%s3440_s22 + $0x78] sm:$0xff]  ;;  %v823_v17 = vld [vmem:[%s3930_s5 + $0x80] sm:$0xff]  ;;  %v824_v18 = vld [vmem:[%s3930_s5 + $0x88] sm:$0xff] }
  0x1d   : > { %v3081_v52 = vpack.c.bf16 %v606_v51, %v605_v50  ;;  %v3087_v22 = vpack.c.bf16 %v824_v18, %v823_v17  ;;  %v807_v23 = vld [vmem:[%s3930_s5] sm:$0xff]  ;;  %v826_v26 = vld [vmem:[%s3930_s5 + $0x98] sm:$0xff]  ;;  %v809_v29 = vld [vmem:[%s3930_s5 + $0x10] sm:$0xff] }
  0x1e   : > { %3062 = vmatpush3.bf16.msra.mxu1 %v3061_v24  ;;  %v808_v24 = vld [vmem:[%s3930_s5 + $0x8] sm:$0xff]  ;;  %v811_v35 = vld [vmem:[%s3930_s5 + $0x20] sm:$0xff]  ;;  %v830_v38 = vld [vmem:[%s3930_s5 + $0xb8] sm:$0xff] }
  0x1f   : > { %3064 = vmatprep.subr.bf16.mxu1 %v3063_v25  ;;  %v825_v25 = vld [vmem:[%s3930_s5 + $0x90] sm:$0xff]  ;;  %v3089_v27 = vpack.c.bf16 %v808_v24, %v807_v23  ;;  %v828_v32 = vld [vmem:[%s3930_s5 + $0xa8] sm:$0xff]  ;;  %v815_v47 = vld [vmem:[%s3930_s5 + $0x40] sm:$0xff] }
  0x20   : > { %v3091_v28 = vpack.c.bf16 %v826_v26, %v825_v25  ;;  %v813_v41 = vld [vmem:[%s3930_s5 + $0x30] sm:$0xff]  ;;  %v832_v44 = vld [vmem:[%s3930_s5 + $0xc8] sm:$0xff]  ;;  %v834_v50 = vld [vmem:[%s3930_s5 + $0xd8] sm:$0xff] }
  0x21   : > { %v1021_v17 = vld [vmem:[%s3609_s23 + $0x18] sm:$0xff]  ;;  %v1038_v18 = vld [vmem:[%s3609_s23 + $0xa0] sm:$0xff]  ;;  %v1023_v25 = vld [vmem:[%s3609_s23 + $0x28] sm:$0xff] }
  0x22   : > { %3066 = vmatpush3.bf16.msra.mxu1 %v3065_v30  ;;  %v810_v30 = vld [vmem:[%s3930_s5 + $0x18] sm:$0xff]  ;;  %v1022_v24 = vld [vmem:[%s3609_s23 + $0x20] sm:$0xff]  ;;  %v1040_v26 = vld [vmem:[%s3609_s23 + $0xb0] sm:$0xff] }
  0x23   : > { %3068 = vmatprep.subr.bf16.mxu1 %v3067_v31  ;;  %v827_v31 = vld [vmem:[%s3930_s5 + $0xa0] sm:$0xff]  ;;  %v3093_v33 = vpack.c.bf16 %v810_v30, %v809_v29  ;;  %v1024_v30 = vld [vmem:[%s3609_s23 + $0x30] sm:$0xff] }
  0x24   : > { %v3095_v34 = vpack.c.bf16 %v828_v32, %v827_v31  ;;  %v1025_v31 = vld [vmem:[%s3609_s23 + $0x38] sm:$0xff]  ;;  %v1042_v32 = vld [vmem:[%s3609_s23 + $0xc0] sm:$0xff] }
  0x26   : > { %3070 = vmatpush3.bf16.msra.mxu1 %v3069_v36  ;;  %v812_v36 = vld [vmem:[%s3930_s5 + $0x28] sm:$0xff] }
  0x27   : > { %3072 = vmatprep.subr.bf16.mxu1 %v3071_v37  ;;  %v829_v37 = vld [vmem:[%s3930_s5 + $0xb0] sm:$0xff]  ;;  %v3097_v39 = vpack.c.bf16 %v812_v36, %v811_v35  ;;  %v1026_v36 = vld [vmem:[%s3609_s23 + $0x40] sm:$0xff] }
  0x28   : > { %v3099_v40 = vpack.c.bf16 %v830_v38, %v829_v37  ;;  %v1027_v37 = vld [vmem:[%s3609_s23 + $0x48] sm:$0xff]  ;;  %v1044_v38 = vld [vmem:[%s3609_s23 + $0xd0] sm:$0xff] }
  0x2a   : > { %3074 = vmatpush3.bf16.msra.mxu1 %v3073_v42  ;;  %v814_v42 = vld [vmem:[%s3930_s5 + $0x38] sm:$0xff] }
  0x2b   : > { %3076 = vmatprep.subr.bf16.mxu1 %v3075_v43  ;;  %v831_v43 = vld [vmem:[%s3930_s5 + $0xc0] sm:$0xff]  ;;  %v3101_v45 = vpack.c.bf16 %v814_v42, %v813_v41  ;;  %v1028_v42 = vld [vmem:[%s3609_s23 + $0x50] sm:$0xff] }
  0x2c   : > { %v3103_v46 = vpack.c.bf16 %v832_v44, %v831_v43  ;;  %v1029_v43 = vld [vmem:[%s3609_s23 + $0x58] sm:$0xff]  ;;  %v1046_v44 = vld [vmem:[%s3609_s23 + $0xe0] sm:$0xff] }
  0x2e   : > { %3078 = vmatpush3.bf16.msra.mxu1 %v3077_v48  ;;  %v816_v48 = vld [vmem:[%s3930_s5 + $0x48] sm:$0xff] }
  0x2f   : > { %3080 = vmatprep.subr.bf16.mxu1 %v3079_v49  ;;  %v833_v49 = vld [vmem:[%s3930_s5 + $0xd0] sm:$0xff]  ;;  %v3105_v51 = vpack.c.bf16 %v816_v48, %v815_v47  ;;  %v1030_v48 = vld [vmem:[%s3609_s23 + $0x60] sm:$0xff] }
  0x32   : > { %3082 = vmatpush3.bf16.msra.mxu1 %v3081_v52  ;;  %v3107_v52 = vpack.c.bf16 %v834_v50, %v833_v49  ;;  %v1031_v49 = vld [vmem:[%s3609_s23 + $0x68] sm:$0xff]  ;;  %v1048_v50 = vld [vmem:[%s3609_s23 + $0xf0] sm:$0xff] }
  0xea   : > { %v2892_v53 = vpop.f32.mrb[0].mxu0 }
  0xeb   : > { %v697_v54 = vpop.f32.mrb[1].mxu0 }
  0xec   : > { %777 = vmatmul.mubr.f32.vlgmr.msra.gmra.mrb[0].mxu1 %v697_v54  ;;  %v818_v54 = vld [vmem:[%s3930_s5 + $0x58] sm:$0xff] }
  0xed   : > { %781 = vmatprep.mubr.f32.mxu1 %v3442_v1 }
  0xf0   : > { %782 = vmatmul.mubr.f32.gmra.mrb[2].mxu1 %v2892_v53  ;;  %v817_v53 = vld [vmem:[%s3930_s5 + $0x50] sm:$0xff] }
  0xf1   : > { %2904 = vmatprep.mubr.msk.f32.mxu1 %vm624_vm0, %v3453_v7 }
 0x1bf   : > { %v2717_v55 = vpop.f32.mrb[0].mxu1 }
 0x1c0   : > { %v2718_v57 = vpop.f32.mrb[1].mxu1 }
 0x1c1   : > { %v2719_v58 = vadd.f32 %v2718_v57, %v2717_v55  ;;  %v835_v55 = vld [vmem:[%s3930_s5 + $0xe0] sm:$0xff]  ;;  %v3109_v57 = vpack.c.bf16 %v818_v54, %v817_v53  ;;  %v1032_v54 = vld [vmem:[%s3609_s23 + $0x70] sm:$0xff] }
 0x1c3   : > { %v779_v59 = vadd.f32 %v2719_v58, %v2611_v56  ;;  %v2720_v60 = vpop.f32.mrb[2].mxu1 }
 0x1c4   : > { %v2721_v61 = vpop.f32.mrb[3].mxu1 }
 0x1c5   : > { %v789_v62 = vmin.f32 %v779_v59, 20.0  ;;  %v2722_v63 = vadd.f32 %v2721_v61, %v2720_v60  ;;  %vm787_vm1 = vcmp.gt.f32.partialorder %v779_v59, 20.0  ;;  %v820_v60 = vld [vmem:[%s3930_s5 + $0x68] sm:$0xff]  ;;  %v837_v61 = vld [vmem:[%s3930_s5 + $0xf0] sm:$0xff] }
 0x1c7   : > { %v791_v0 = vmul.f32 1.442695, %v789_v62  ;;  %v784_v2 = vadd.f32 %v2722_v63, %v2611_v56  ;;  %v836_v56 = vld [vmem:[%s3930_s5 + $0xe8] sm:$0xff]  ;;  %v838_v62 = vld [vmem:[%s3930_s5 + $0xf8] sm:$0xff] }
 0x1c8   : > { %v3111_v58 = vpack.c.bf16 %v836_v56, %v835_v55  ;;  %v1033_v55 = vld [vmem:[%s3609_s23 + $0x78] sm:$0xff] }
 0x1c9   : > { %3247 = vpow2.f32 %v791_v0  ;;  %v790_v1 = vmin.f32 %v784_v2, 20.0  ;;  %vm788_vm2 = vcmp.gt.f32.partialorder %v784_v2, 20.0  ;;  %v3115_v0 = vpack.c.bf16 %v838_v62, %v837_v61 }
 0x1ca   : > { %v3153_v56 = vpack.c.bf16 %v1033_v55, %v1032_v54  ;;  %v1329_v55 = vld [vmem:[%s3936_s11 + $0x20] sm:$0xff] }
 0x1cb   : > { %v793_v3 = vmul.f32 1.442695, %v790_v1  ;;  %v822_v1 = vld [vmem:[%s3930_s5 + $0x78] sm:$0xff] }
 0x1cd   : > { %3249 = vpow2.f32 %v793_v3 }
 0x1d3   : > { %v3248_v4 = vpop.eup %3247 }
 0x1d4   : > { %v795_v5 = vadd.f32 1.0, %v3248_v4 }
 0x1d6   : > { %3251 = vlog2.f32 %v795_v5 }
 0x1d7   : > { %v3250_v6 = vpop.eup %3249 }
 0x1d8   : > { %v796_v7 = vadd.f32 1.0, %v3250_v6  ;;  %v1034_v6 = vld [vmem:[%s3609_s23 + $0x80] sm:$0xff] }
 0x1da   : > { %3253 = vlog2.f32 %v796_v7  ;;  %v1035_v7 = vld [vmem:[%s3609_s23 + $0x88] sm:$0xff] }
 0x1e0   : > { %v3252_v8 = vpop.eup %3251 }
 0x1e1   : > { %v798_v9 = vmul.f32 0.6931472, %v3252_v8  ;;  %v1018_v8 = vld [vmem:[%s3609_s23] sm:$0xff] }
 0x1e3   : > { %v801_v10 = vsel %vm787_vm1, %v779_v59, %v798_v9  ;;  %v3123_v9 = vpack.c.bf16 %v1035_v7, %v1034_v6 }
 0x1e4   : > { %v3254_v11 = vpop.eup %3253  ;;  %3255 = vtanh.f32 %v801_v10  ;;  %v1019_v10 = vld [vmem:[%s3609_s23 + $0x8] sm:$0xff] }
 0x1e5   : > { %v800_v12 = vmul.f32 0.6931472, %v3254_v11  ;;  %v1036_v11 = vld [vmem:[%s3609_s23 + $0x90] sm:$0xff] }
 0x1e7   : > { %v802_v13 = vsel %vm788_vm2, %v784_v2, %v800_v12  ;;  %v1037_v12 = vld [vmem:[%s3609_s23 + $0x98] sm:$0xff] }
 0x1e8   : > { %3257 = vtanh.f32 %v802_v13  ;;  %v3125_v13 = vpack.c.bf16 %v1019_v10, %v1018_v8 }
 0x1ee   : > { %v3256_v15 = vpop.eup %3255 }
 0x1ef   : > { %v3504_v19 = vmul.f32 %v3256_v15, %v779_v59  ;;  %v819_v59 = vld [vmem:[%s3930_s5 + $0x60] sm:$0xff]  ;;  %v3127_v15 = vpack.c.bf16 %v1037_v12, %v1036_v11 }
 0x1f0   : > { %v3113_v63 = vpack.c.bf16 %v820_v60, %v819_v59 }
 0x1f2   : > { %v3258_v16 = vpop.eup %3257 }
 0x1f3   : > { %v3506_v20 = vmul.f32 %v3258_v16, %v784_v2  ;;  %v821_v2 = vld [vmem:[%s3930_s5 + $0x70] sm:$0xff] }
 0x1f4   : > { %v3117_v3 = vpack.c.bf16 %v822_v1, %v821_v2  ;;  %v1020_v16 = vld [vmem:[%s3609_s23 + $0x10] sm:$0xff] }
 0x1f5   : > { %v3083_v21 = vpack.c.bf16 %v3506_v20, %v3504_v19 }
 0x1f7   : > { %3084 = vmatprep.subr.bf16.mxu0 %v3083_v21 }
 0x1f8   : > { %3086 = vmatpush3.bf16.msra.mxu0 %v3083_v21  ;;  %v1039_v21 = vld [vmem:[%s3609_s23 + $0xa8] sm:$0xff] }
 0x1f9   : > { %3088 = vmatprep.subr.bf16.mxu0 %v3087_v22  ;;  %v3129_v22 = vpack.c.bf16 %v1021_v17, %v1020_v16  ;;  %v3131_v23 = vpack.c.bf16 %v1039_v21, %v1038_v18 }
 0x1fb   : > { %2898 = vmatmul.mubr.msk.f32.vlgmr.msra.gmra.mrb[2].mxu0 %vm624_vm0, %v3461_v14 }
 0x1fc   : > { %985 = vmatprep.mubr.f32.mxu0 %v3504_v19  ;;  %3090 = vmatpush3.bf16.msra.mxu0 %v3089_v27  ;;  %v1041_v27 = vld [vmem:[%s3609_s23 + $0xb8] sm:$0xff] }
 0x1fd   : > { %3092 = vmatprep.subr.bf16.mxu0 %v3091_v28  ;;  %v3133_v28 = vpack.c.bf16 %v1023_v25, %v1022_v24  ;;  %v3135_v29 = vpack.c.bf16 %v1041_v27, %v1040_v26 }
 0x200   : > { %3094 = vmatpush3.bf16.msra.mxu0 %v3093_v33  ;;  %v1043_v33 = vld [vmem:[%s3609_s23 + $0xc8] sm:$0xff] }
 0x201   : > { %3096 = vmatprep.subr.bf16.mxu0 %v3095_v34  ;;  %v3137_v34 = vpack.c.bf16 %v1025_v31, %v1024_v30  ;;  %v3139_v35 = vpack.c.bf16 %v1043_v33, %v1042_v32  ;;  %v1231_v31 = vld [vmem:[%s3934_s9 + $0x20] sm:$0xff]  ;;  %v1232_v32 = vld [vmem:[%s3934_s9 + $0x28] sm:$0xff] }
 0x202   : > { %v3163_v33 = vpack.c.bf16 %v1232_v32, %v1231_v31 }
 0x204   : > { %3098 = vmatpush3.bf16.msra.mxu0 %v3097_v39  ;;  %v1045_v39 = vld [vmem:[%s3609_s23 + $0xd8] sm:$0xff] }
 0x205   : > { %3100 = vmatprep.subr.bf16.mxu0 %v3099_v40  ;;  %v3141_v40 = vpack.c.bf16 %v1027_v37, %v1026_v36  ;;  %v3143_v41 = vpack.c.bf16 %v1045_v39, %v1044_v38  ;;  %v1235_v37 = vld [vmem:[%s3934_s9 + $0x40] sm:$0xff]  ;;  %v1236_v38 = vld [vmem:[%s3934_s9 + $0x48] sm:$0xff] }
 0x206   : > { %v3171_v39 = vpack.c.bf16 %v1236_v38, %v1235_v37  ;;  %v2618_v37 = vld [vmem:[%s3935_s10] ss:$0 sm:$0xff] }
 0x208   : > { %3102 = vmatpush3.bf16.msra.mxu0 %v3101_v45  ;;  %v1047_v45 = vld [vmem:[%s3609_s23 + $0xe8] sm:$0xff] }
 0x209   : > { %3104 = vmatprep.subr.bf16.mxu0 %v3103_v46  ;;  %v3145_v46 = vpack.c.bf16 %v1029_v43, %v1028_v42  ;;  %v3147_v47 = vpack.c.bf16 %v1047_v45, %v1046_v44  ;;  %v1239_v43 = vld [vmem:[%s3934_s9 + $0x60] sm:$0xff]  ;;  %v1240_v44 = vld [vmem:[%s3934_s9 + $0x68] sm:$0xff]  ;;  %v1241_v45 = vld [vmem:[%s3934_s9 + $0x70] sm:$0xff] }
 0x20c   : > { %3106 = vmatpush3.bf16.msra.mxu0 %v3105_v51  ;;  %v1049_v51 = vld [vmem:[%s3609_s23 + $0xf8] sm:$0xff]  ;;  %s576_s23 = scalar_lea.vmem %s3933_s8, %s3941_s30 }
 0x20d   : > { %3108 = vmatprep.subr.bf16.mxu0 %v3107_v52  ;;  %v3149_v52 = vpack.c.bf16 %v1031_v49, %v1030_v48  ;;  %v3151_v53 = vpack.c.bf16 %v1049_v51, %v1048_v50  ;;  %v1325_v49 = vld [vmem:[%s3936_s11] sm:$0xff]  ;;  %v1326_v50 = vld [vmem:[%s3936_s11 + $0x8] sm:$0xff]  ;;  %v1327_v51 = vld [vmem:[%s3936_s11 + $0x10] sm:$0xff] }
 0x210   : > { %3110 = vmatpush3.bf16.msra.mxu0 %v3109_v57 }
 0x211   : > { %3112 = vmatprep.subr.bf16.mxu0 %v3111_v58  ;;  %v2614_v58 = vld [vmem:[%s3931_s6] ss:$0 sm:$0xff] }
 0x214   : > { %3114 = vmatpush3.bf16.msra.mxu0 %v3113_v63 }
 0x215   : > { %3116 = vmatprep.subr.bf16.mxu0 %v3115_v0 }
 0x218   : > { %3118 = vmatpush3.bf16.msra.mxu0 %v3117_v3 }
 0x219   : > { %3124 = vmatprep.subr.bf16.mxu0 %v3123_v9 }
 0x2ce   : > { %v2899_v4 = vpop.f32.mrb[2].mxu0 }
 0x2cf   : > { %v906_v5 = vpop.f32.mrb[3].mxu0 }
 0x2d0   : > { %986 = vmatmul.mubr.f32.vlgmr.msra.gmra.mrb[4].mxu0 %v906_v5 }
 0x2d1   : > { %990 = vmatprep.mubr.f32.mxu0 %v3506_v20  ;;  %3126 = vmatpush3.bf16.msra.mxu0 %v3125_v13 }
 0x2d2   : > { %3128 = vmatprep.subr.bf16.mxu0 %v3127_v15 }
 0x2d4   : > { %991 = vmatmul.mubr.f32.gmra.mrb[6].mxu0 %v2899_v4 }
 0x2d5   : > { %3130 = vmatpush3.bf16.msra.mxu0 %v3129_v22 }
 0x2d6   : > { %3132 = vmatprep.subr.bf16.mxu0 %v3131_v23 }
 0x2d9   : > { %3134 = vmatpush3.bf16.msra.mxu0 %v3133_v28  ;;  %v1228_v28 = vld [vmem:[%s3934_s9 + $0x8] sm:$0xff] }
 0x2da   : > { %3136 = vmatprep.subr.bf16.mxu0 %v3135_v29  ;;  %v1230_v29 = vld [vmem:[%s3934_s9 + $0x18] sm:$0xff] }
 0x2dd   : > { %3138 = vmatpush3.bf16.msra.mxu0 %v3137_v34  ;;  %v1233_v34 = vld [vmem:[%s3934_s9 + $0x30] sm:$0xff] }
 0x2de   : > { %3140 = vmatprep.subr.bf16.mxu0 %v3139_v35  ;;  %v1234_v35 = vld [vmem:[%s3934_s9 + $0x38] sm:$0xff] }
 0x2df   : > { %v3167_v36 = vpack.c.bf16 %v1234_v35, %v1233_v34  ;;  %v1339_v34 = vld [vmem:[%s3936_s11 + $0x70] sm:$0xff]  ;;  %v1340_v35 = vld [vmem:[%s3936_s11 + $0x78] sm:$0xff] }
 0x2e1   : > { %3142 = vmatpush3.bf16.msra.mxu0 %v3141_v40  ;;  %v1237_v40 = vld [vmem:[%s3934_s9 + $0x50] sm:$0xff] }
 0x2e2   : > { %3144 = vmatprep.subr.bf16.mxu0 %v3143_v41  ;;  %v1238_v41 = vld [vmem:[%s3934_s9 + $0x58] sm:$0xff] }
 0x2e3   : > { %v3175_v42 = vpack.c.bf16 %v1238_v41, %v1237_v40 }
 0x2e5   : > { %3146 = vmatpush3.bf16.msra.mxu0 %v3145_v46  ;;  %v3179_v46 = vpack.c.bf16 %v1240_v44, %v1239_v43 }
 0x2e6   : > { %3148 = vmatprep.subr.bf16.mxu0 %v3147_v47  ;;  %v1242_v47 = vld [vmem:[%s3934_s9 + $0x78] sm:$0xff] }
 0x2e7   : > { %v3183_v48 = vpack.c.bf16 %v1242_v47, %v1241_v45 }
 0x2e9   : > { %3150 = vmatpush3.bf16.msra.mxu0 %v3149_v52  ;;  %v3187_v52 = vpack.c.bf16 %v1326_v50, %v1325_v49 }
 0x2ea   : > { %3152 = vmatprep.subr.bf16.mxu0 %v3151_v53  ;;  %v1328_v53 = vld [vmem:[%s3936_s11 + $0x18] sm:$0xff] }
 0x2eb   : > { %v3191_v54 = vpack.c.bf16 %v1328_v53, %v1327_v51 }
 0x2ed   : > { %3154 = vmatpush3.bf16.msra.mxu0 %v3153_v56  ;;  %v1330_v56 = vld [vmem:[%s3936_s11 + $0x28] sm:$0xff] }
 0x2ee   : > { %3188 = vmatprep.subr.bf16.mxu0 %v3187_v52 }
 0x3a3   : > { %v2759_v57 = vpop.f32.mrb[4].mxu0 }
 0x3a4   : > { %v2760_v59 = vpop.f32.mrb[5].mxu0 }
 0x3a5   : > { %v2761_v60 = vadd.f32 %v2760_v59, %v2759_v57  ;;  %v3195_v57 = vpack.c.bf16 %v1330_v56, %v1329_v55  ;;  %v1332_v59 = vld [vmem:[%s3936_s11 + $0x38] sm:$0xff]  ;;  %v587_v55 = vld [vmem:[%s555_s21] sm:$0xff] }
 0x3a7   : > { %v988_v61 = vadd.f32 %v2761_v60, %v2614_v58  ;;  %v2762_v62 = vpop.f32.mrb[6].mxu0 }
 0x3a8   : > { %v2763_v63 = vpop.f32.mrb[7].mxu0 }
 0x3a9   : > { %v998_v0 = vmin.f32 %v988_v61, 20.0  ;;  %v2764_v2 = vadd.f32 %v2763_v63, %v2762_v62  ;;  %vm996_vm3 = vcmp.gt.f32.partialorder %v988_v61, 20.0  ;;  %v1334_v62 = vld [vmem:[%s3936_s11 + $0x48] sm:$0xff] }
 0x3ab   : > { %v1000_v1 = vmul.f32 1.442695, %v998_v0  ;;  %v993_v3 = vadd.f32 %v2764_v2, %v2614_v58  ;;  %v1331_v58 = vld [vmem:[%s3936_s11 + $0x30] sm:$0xff]  ;;  %v1336_v2 = vld [vmem:[%s3936_s11 + $0x58] sm:$0xff] }
 0x3ac   : > { %v3199_v60 = vpack.c.bf16 %v1332_v59, %v1331_v58  ;;  %v1335_v0 = vld [vmem:[%s3936_s11 + $0x50] sm:$0xff] }
 0x3ad   : > { %3259 = vpow2.f32 %v1000_v1  ;;  %v999_v4 = vmin.f32 %v993_v3, 20.0  ;;  %vm997_vm4 = vcmp.gt.f32.partialorder %v993_v3, 20.0  ;;  %v3207_v1 = vpack.c.bf16 %v1336_v2, %v1335_v0  ;;  %v588_v0 = vld [vmem:[%s555_s21 + $0x8] sm:$0xff] }
 0x3af   : > { %v1002_v5 = vmul.f32 1.442695, %v999_v4  ;;  %v1338_v4 = vld [vmem:[%s3936_s11 + $0x68] sm:$0xff] }
 0x3b1   : > { %3261 = vpow2.f32 %v1002_v5 }
 0x3b7   : > { %v3260_v6 = vpop.eup %3259 }
 0x3b8   : > { %v1004_v7 = vadd.f32 1.0, %v3260_v6 }
 0x3ba   : > { %3263 = vlog2.f32 %v1004_v7  ;;  %v2617_v7 = vld [vmem:[%s576_s23] ss:$0 sm:$0xff] }
 0x3bb   : > { %v3262_v8 = vpop.eup %3261 }
 0x3bc   : > { %v1005_v9 = vadd.f32 1.0, %v3262_v8 }
 0x3be   : > { %3265 = vlog2.f32 %v1005_v9 }
 0x3c4   : > { %v3264_v10 = vpop.eup %3263 }
 0x3c5   : > { %v1007_v11 = vmul.f32 0.6931472, %v3264_v10 }
 0x3c7   : > { %v1010_v12 = vsel %vm996_vm3, %v988_v61, %v1007_v11 }
 0x3c8   : > { %v3266_v13 = vpop.eup %3265  ;;  %3267 = vtanh.f32 %v1010_v12 }
 0x3c9   : > { %v1009_v15 = vmul.f32 0.6931472, %v3266_v13 }
 0x3cb   : > { %v1011_v16 = vsel %vm997_vm4, %v993_v3, %v1009_v15 }
 0x3cc   : > { %3269 = vtanh.f32 %v1011_v16 }
 0x3d2   : > { %v3268_v17 = vpop.eup %3267 }
 0x3d3   : > { %v1014_v18 = vmul.f32 %v3268_v17, %v988_v61  ;;  %v1333_v61 = vld [vmem:[%s3936_s11 + $0x40] sm:$0xff] }
 0x3d4   : > { %v3203_v63 = vpack.c.bf16 %v1334_v62, %v1333_v61  ;;  %v3339_v62 = vmov 0.0|0.0  }
 0x3d5   : > { %v1016_v21 = vadd.f32 %v1014_v18, %v3504_v19  ;;  %v1227_v19 = vld [vmem:[%s3934_s9] sm:$0xff] }
 0x3d6   : > { %v3270_v22 = vpop.eup %3269 }
 0x3d7   : > { %1196 = vmatprep.mubr.f32.mxu0 %v1016_v21  ;;  %v1015_v23 = vmul.f32 %v3270_v22, %v993_v3  ;;  %v1337_v3 = vld [vmem:[%s3936_s11 + $0x60] sm:$0xff] }
 0x3d8   : > { %v3211_v5 = vpack.c.bf16 %v1338_v4, %v1337_v3 }
 0x3d9   : > { %v1017_v24 = vadd.f32 %v1015_v23, %v3506_v20  ;;  %v3155_v20 = vpack.c.bf16 %v1228_v28, %v1227_v19 }
 0x3db   : > { %v3119_v25 = vpack.c.bf16 %v1017_v24, %v1016_v21 }
 0x3dd   : > { %3120 = vmatprep.subr.bf16.mxu1 %v3119_v25 }
 0x3de   : > { %3122 = vmatpush3.bf16.msra.mxu1 %v3119_v25 }
 0x3df   : > { %3156 = vmatprep.subr.bf16.mxu1 %v3155_v20 }
 0x3e1   : > { %2905 = vmatmul.mubr.msk.f32.vlgmr.msra.gmra.mrb[4].mxu1 %vm624_vm0, %v3461_v14  ;;  %v1229_v14 = vld [vmem:[%s3934_s9 + $0x10] sm:$0xff] }
 0x3e2   : > { %3158 = vmatpush3.bf16.msra.mxu1 %v3155_v20  ;;  %v3159_v30 = vpack.c.bf16 %v1230_v29, %v1229_v14 }
 0x3e4   : > { %3160 = vmatprep.subr.bf16.mxu1 %v3159_v30 }
 0x3e6   : > { %3162 = vmatpush3.bf16.msra.mxu1 %v3159_v30 }
 0x3e7   : > { %3164 = vmatprep.subr.bf16.mxu1 %v3163_v33 }
 0x3ea   : > { %3166 = vmatpush3.bf16.msra.mxu1 %v3163_v33 }
 0x3eb   : > { %3168 = vmatprep.subr.bf16.mxu1 %v3167_v36 }
 0x3ee   : > { %3170 = vmatpush3.bf16.msra.mxu1 %v3167_v36  ;;  %v3215_v36 = vpack.c.bf16 %v1340_v35, %v1339_v34 }
 0x3ef   : > { %3172 = vmatprep.subr.bf16.mxu1 %v3171_v39 }
 0x3f2   : > { %3174 = vmatpush3.bf16.msra.mxu1 %v3171_v39 }
 0x3f3   : > { %3176 = vmatprep.subr.bf16.mxu1 %v3175_v42 }
 0x3f6   : > { %3178 = vmatpush3.bf16.msra.mxu1 %v3175_v42  ;;  %v2619_v42 = vld [vmem:[%s3937_s12] ss:$0 sm:$0xff] }
 0x3f7   : > { %3180 = vmatprep.subr.bf16.mxu1 %v3179_v46 }
 0x3fa   : > { %3182 = vmatpush3.bf16.msra.mxu1 %v3179_v46 }
 0x3fb   : > { %3184 = vmatprep.subr.bf16.mxu1 %v3183_v48 }
 0x3fe   : > { %3186 = vmatpush3.bf16.msra.mxu1 %v3183_v48 }
 0x4b4   : > { %v2906_v26 = vpop.f32.mrb[4].mxu1 }
 0x4b5   : > { %v1117_v27 = vpop.f32.mrb[5].mxu1 }
 0x4b6   : > { %1197 = vmatmul.mubr.f32.vlgmr.msra.gmra.mrb[8].mxu0 %v1117_v27 }
 0x4b7   : > { %1201 = vmatprep.mubr.f32.mxu0 %v1017_v24  ;;  %3190 = vmatpush3.bf16.msra.mxu0 %v3187_v52 }
 0x4b8   : > { %3192 = vmatprep.subr.bf16.mxu0 %v3191_v54 }
 0x4ba   : > { %1202 = vmatmul.mubr.f32.gmra.mrb[10].mxu0 %v2906_v26 }
 0x4bb   : > { %3194 = vmatpush3.bf16.msra.mxu0 %v3191_v54 }
 0x4bc   : > { %3196 = vmatprep.subr.bf16.mxu0 %v3195_v57 }
 0x4bf   : > { %3198 = vmatpush3.bf16.msra.mxu0 %v3195_v57 }
 0x4c0   : > { %3200 = vmatprep.subr.bf16.mxu0 %v3199_v60 }
 0x4c3   : > { %3202 = vmatpush3.bf16.msra.mxu0 %v3199_v60 }
 0x4c4   : > { %3204 = vmatprep.subr.bf16.mxu0 %v3203_v63 }
 0x4c7   : > { %3206 = vmatpush3.bf16.msra.mxu0 %v3203_v63 }
 0x4c8   : > { %3208 = vmatprep.subr.bf16.mxu0 %v3207_v1 }
 0x4cb   : > { %3210 = vmatpush3.bf16.msra.mxu0 %v3207_v1 }
 0x4cc   : > { %3212 = vmatprep.subr.bf16.mxu0 %v3211_v5 }
 0x4cf   : > { %3214 = vmatpush3.bf16.msra.mxu0 %v3211_v5 }
 0x4d0   : > { %3216 = vmatprep.subr.bf16.mxu0 %v3215_v36 }
 0x4d3   : > { %3218 = vmatpush3.bf16.msra.mxu0 %v3215_v36 }
 0x589   : > { %v2801_v6 = vpop.f32.mrb[8].mxu0 }
 0x58a   : > { %v2802_v8 = vpop.f32.mrb[9].mxu0 }
 0x58b   : > { %v2803_v9 = vadd.f32 %v2802_v8, %v2801_v6 }
 0x58d   : > { %v1199_v10 = vadd.f32 %v2803_v9, %v2617_v7  ;;  %v2804_v11 = vpop.f32.mrb[10].mxu0 }
 0x58e   : > { %v2805_v12 = vpop.f32.mrb[11].mxu0 }
 0x58f   : > { %v1209_v13 = vmin.f32 %v1199_v10, 20.0  ;;  %v2806_v15 = vadd.f32 %v2805_v12, %v2804_v11  ;;  %vm1207_vm5 = vcmp.gt.f32.partialorder %v1199_v10, 20.0  ;;  %v1889_v11 = vsel %vm624_vm0, %v588_v0, 0.0 }
 0x591   : > { %v1211_v16 = vmul.f32 1.442695, %v1209_v13  ;;  %v1204_v17 = vadd.f32 %v2806_v15, %v2617_v7 }
 0x593   : > { %3271 = vpow2.f32 %v1211_v16  ;;  %v1210_v18 = vmin.f32 %v1204_v17, 20.0  ;;  %vm1208_vm6 = vcmp.gt.f32.partialorder %v1204_v17, 20.0 }
 0x595   : > { %v1213_v21 = vmul.f32 1.442695, %v1210_v18 }
 0x597   : > { %3273 = vpow2.f32 %v1213_v21 }
 0x59d   : > { %v3272_v22 = vpop.eup %3271 }
 0x59e   : > { %v1215_v23 = vadd.f32 1.0, %v3272_v22 }
 0x5a0   : > { %3275 = vlog2.f32 %v1215_v23 }
 0x5a1   : > { %v3274_v24 = vpop.eup %3273 }
 0x5a2   : > { %v1216_v25 = vadd.f32 1.0, %v3274_v24 }
 0x5a4   : > { %3277 = vlog2.f32 %v1216_v25 }
 0x5aa   : > { %v3276_v26 = vpop.eup %3275 }
 0x5ab   : > { %v1218_v27 = vmul.f32 0.6931472, %v3276_v26 }
 0x5ad   : > { %v1221_v19 = vsel %vm1207_vm5, %v1199_v10, %v1218_v27 }
 0x5ae   : > { %v3278_v28 = vpop.eup %3277  ;;  %3279 = vtanh.f32 %v1221_v19 }
 0x5af   : > { %v1220_v20 = vmul.f32 0.6931472, %v3278_v28  ;;  %v3341_v28 = vmov 0.0  }
 0x5b1   : > { %v1222_v14 = vsel %vm1208_vm6, %v1204_v17, %v1220_v20 }
 0x5b2   : > { %3281 = vtanh.f32 %v1222_v14 }
 0x5b8   : > { %v3280_v29 = vpop.eup %3279 }
 0x5b9   : > { %v1225_v30 = vmul.f32 %v3280_v29, %v1199_v10  ;;  %v1888_v10 = vsel %vm624_vm0, %v587_v55, 0.0 }
 0x5ba   : > { %v1890_v13 = vadd.f32 %v1889_v11, %v1888_v10 }
 0x5bb   : > { %2939 = vmatprep.mubr.f32.mxu1 %v1225_v30 }
 0x5bc   : > { %v3282_v31 = vpop.eup %3281  ;;  %v1891_v16 = vrot.slane %v1890_v13, 4 }
 0x5bd   : > { %v1226_v32 = vmul.f32 %v3282_v31, %v1204_v17 }
 0x5be   : > { %v1892_v18 = vadd.f32 %v1891_v16, %v1890_v13 }
 0x5bf   : > { %2940 = vmatmul.mubr.f32.vlgmr.msra.gmra.mrb[6].mxu1 %v1226_v32  ;;  %v3219_v33 = vpack.c.bf16 %v1226_v32, %v1225_v30 }
 0x5c0   : > { %v1893_v22 = vrot.slane %v1892_v18, 2 }
 0x5c1   : > { %3220 = vmatprep.subr.bf16.mxu1 %v3219_v33 }
 0x5c2   : > { %3222 = vmatpush3.bf16.msra.mxu1 %v3219_v33  ;;  %v1894_v24 = vadd.f32 %v1893_v22, %v1892_v18 }
 0x5c3   : > { %3227 = vmatprep.subr.bf16.mxu1 %v3339_v62 }
 0x5c4   : > { %v1895_v26 = vrot.slane %v1894_v24, 1 }
 0x5c6   : > { %v3795_v19 = vadd.f32 %v1895_v26, %v1894_v24 }
 0x692   : > { %v2941_v38 = vpop.f32.mrb[6].mxu1 }
 0x693   : > { %v1316_v39 = vpop.f32.mrb[7].mxu1  ;;  %v1322_v41 = vadd.f32 %v2941_v38, %v2618_v37 }
 0x694   : > { %v1317_v40 = vadd.f32 %v2618_v37, %v1316_v39 }
 0x696   : > { %2974 = vmatprep.mubr.f32.mxu0 %v1317_v40 }
 0x697   : > { %2975 = vmatmul.mubr.f32.vlgmr.msra.gmra.mrb[12].mxu0 %v1322_v41 }
 0x698   : > { %3009 = vmatprep.mubr.msk.f32.mxu0 %vm624_vm0, %v587_v55 }
 0x76a   : > { %v2976_v43 = vpop.f32.mrb[12].mxu0 }
 0x76b   : > { %v1414_v44 = vpop.f32.mrb[13].mxu0  ;;  %v1420_v46 = vadd.f32 %v2976_v43, %v2619_v42 }
 0x76c   : > { %v1415_v45 = vadd.f32 %v2619_v42, %v1414_v44 }
 0x76e   : > { %1423 = vmax.xlane.f32.xlu0 %v1415_v45 }
 0x772   : > { %1425 = vmax.xlane.f32.xlu0 %v1420_v46 }
 0x7fb   : > { %v1424_v47 = vpop.xlane.xlu0 %1423 }
 0x7fc   : > { %v1427_v48 = vsub.f32 %v1415_v45, %v1424_v47 }
 0x7fe   : > { %v1429_v49 = vmul.f32 1.442695, %v1427_v48 }
 0x7ff   : > { %v1426_v50 = vpop.xlane.xlu0 %1425 }
 0x800   : > { %3283 = vpow2.f32 %v1429_v49  ;;  %v1428_v51 = vsub.f32 %v1420_v46, %v1426_v50 }
 0x802   : > { %v1431_v52 = vmul.f32 1.442695, %v1428_v51 }
 0x804   : > { %3285 = vpow2.f32 %v1431_v52 }
 0x80a   : > { %v3284_v53 = vpop.eup %3283 }
 0x80b   : > { %1433 = vadd.xlane.f32.xlu1 %v3284_v53 }
 0x80e   : > { %v3286_v54 = vpop.eup %3285 }
 0x80f   : > { %1435 = vadd.xlane.f32.xlu1 %v3286_v54 }
 0x898   : > { %v1434_v56 = vpop.xlane.xlu1 %1433 }
 0x899   : > { %3287 = vrcp.f32 %v1434_v56 }
 0x89c   : > { %v1436_v57 = vpop.xlane.xlu1 %1435 }
 0x89d   : > { %3289 = vrcp.f32 %v1436_v57 }
 0x8a3   : > { %v3288_v58 = vpop.eup %3287 }
 0x8a4   : > { %v3761_v59 = vmul.f32 %v3288_v58, %v3284_v53 }
 0x8a6   : > { %1441 = vxpose.xlu0.b32.start [1/2] (short) %v3761_v59, 128 }
 0x8a7   : > { %v3290_v60 = vpop.eup %3289 }
 0x8a8   : > { %v3764_v61 = vmul.f32 %v3290_v60, %v3286_v54 }
 0x8aa   : > { %1442 = vxpose.xlu0.b32.end [2/2] (short) %v3764_v61, 128  ;;  %v3223_v63 = vpack.c.bf16 %v3764_v61, %v3761_v59 }
 0x8ac   : > { %3224 = vmatprep.subr.bf16.mxu0 %v3223_v63 }
 0x8ad   : > { %3226 = vmatpush3.bf16.msra.mxu0 %v3223_v63 }
 0x8ae   : > { %3231 = vmatprep.subr.bf16.mxu0 %v3223_v63 }
 0x8b0   : > { %3010 = vmatmul.mubr.msk.f32.vlgmr.msra.gmra.mrb[14].mxu0 %vm624_vm0, %v588_v0 }
 0x8b1   : > { %3233 = vmatpush3.bf16.msra.mxu0 %v3223_v63 }
 0x926   : > { %v1457_v2 = vpop.trf.xlu0 }
 0x927   : > { %2981 = vmatprep.mubr.msk.f32.mxu1 %vm624_vm0, %v1457_v2  ;;  %3023 = vmatprep.mubr.msk.f32.mxu0 %vm624_vm0, %v1457_v2 }
 0x92a   : > { %v1458_v1 = vpop.trf.xlu0 }
 0x92b   : > { %2982 = vmatmul.mubr.msk.f32.vlgmr.msra.gmra.mrb[8].mxu1 %vm624_vm0, %v1458_v1  ;;  %3024 = vmatmul.mubr.msk.f32.vlgmr.msra.gmra.mrb[16].mxu0 %vm624_vm0, %v1458_v1 }
 0x92c   : > { %3229 = vmatpush3.bf16.msra.mxu1 %v3223_v63 }
 0x92d   : > { %3234 = vmatprep.subr.bf16.mxu1 %v3223_v63 }
 0x92e   : > { %v1459_v3 = vpop.trf.xlu0 }
 0x92f   : > { %2984 = vmatprep.mubr.msk.f32.mxu1 %vm624_vm0, %v1459_v3  ;;  %3026 = vmatprep.mubr.msk.f32.mxu0 %vm624_vm0, %v1459_v3 }
 0x932   : > { %v1460_v4 = vpop.trf.xlu0 }
 0x933   : > { %2985 = vmatmul.mubr.msk.f32.gmra.mrb[10].mxu1 %vm624_vm0, %v1460_v4  ;;  %3027 = vmatmul.mubr.msk.f32.gmra.mrb[18].mxu0 %vm624_vm0, %v1460_v4 }
 0x936   : > { %v1461_v5 = vpop.trf.xlu0 }
 0x937   : > { %2987 = vmatprep.mubr.msk.f32.mxu1 %vm624_vm0, %v1461_v5  ;;  %3029 = vmatprep.mubr.msk.f32.mxu0 %vm624_vm0, %v1461_v5 }
 0x93a   : > { %v1462_v6 = vpop.trf.xlu0 }
 0x93b   : > { %2988 = vmatmul.mubr.msk.f32.gmra.mrb[12].mxu1 %vm624_vm0, %v1462_v6  ;;  %3030 = vmatmul.mubr.msk.f32.gmra.mrb[20].mxu0 %vm624_vm0, %v1462_v6 }
 0x93e   : > { %v1463_v7 = vpop.trf.xlu0 }
 0x93f   : > { %2990 = vmatprep.mubr.msk.f32.mxu1 %vm624_vm0, %v1463_v7  ;;  %3032 = vmatprep.mubr.msk.f32.mxu0 %vm624_vm0, %v1463_v7 }
 0x942   : > { %v1464_v8 = vpop.trf.xlu0 }
 0x943   : > { %2991 = vmatmul.mubr.msk.f32.gmra.mrb[14].mxu1 %vm624_vm0, %v1464_v8  ;;  %3033 = vmatmul.mubr.msk.f32.gmra.mrb[22].mxu0 %vm624_vm0, %v1464_v8 }
 0x946   : > { %v1465_v9 = vpop.trf.xlu0 }
 0x947   : > { %2993 = vmatprep.mubr.msk.f32.mxu1 %vm624_vm0, %v1465_v9 }
 0x94a   : > { %v1466_v12 = vpop.trf.xlu0 }
 0x94b   : > { %2994 = vmatmul.mubr.msk.f32.gmra.mrb[16].mxu1 %vm624_vm0, %v1466_v12 }
 0x94e   : > { %v1467_v15 = vpop.trf.xlu0 }
 0x94f   : > { %2996 = vmatprep.mubr.msk.f32.mxu1 %vm624_vm0, %v1467_v15 }
 0x952   : > { %v1468_v17 = vpop.trf.xlu0 }
 0x953   : > { %2997 = vmatmul.mubr.msk.f32.gmra.mrb[18].mxu1 %vm624_vm0, %v1468_v17 }
 0x956   : > { %v1469_v21 = vpop.trf.xlu0 }
 0x957   : > { %2999 = vmatprep.mubr.msk.f32.mxu1 %vm624_vm0, %v1469_v21 }
 0x95a   : > { %v1470_v23 = vpop.trf.xlu0 }
 0x95b   : > { %3000 = vmatmul.mubr.msk.f32.gmra.mrb[20].mxu1 %vm624_vm0, %v1470_v23 }
 0x95e   : > { %v1471_v25 = vpop.trf.xlu0 }
 0x95f   : > { %3002 = vmatprep.mubr.msk.f32.mxu1 %vm624_vm0, %v1471_v25 }
 0x962   : > { %v1472_v27 = vpop.trf.xlu0 }
 0x963   : > { %3003 = vmatmul.mubr.msk.f32.gmra.mrb[22].mxu1 %vm624_vm0, %v1472_v27 }
 0x964   : > { %3016 = vmatprep.mubr.msk.f32.mxu1 %vm3340_vm7, %v3341_v28 }
 0x967   : > { %3017 = vmatmul.mubr.msk.f32.vlgmr.msra.gmra.mrb[24].mxu1 %vm624_vm0, %v3795_v19 }
 0x968   : > { %3235 = vmatpush3.bf16.msra.mxu1 %v3223_v63  ;;  %3035 = vmatprep.mubr.msk.f32.mxu1 %vm624_vm0, %v1465_v9 }
 0x96b   : > { %3036 = vmatmul.mubr.msk.f32.vlgmr.msra.gmra.mrb[26].mxu1 %vm624_vm0, %v1466_v12 }
 0x96c   : > { %3038 = vmatprep.mubr.msk.f32.mxu1 %vm624_vm0, %v1467_v15 }
 0x96f   : > { %3039 = vmatmul.mubr.msk.f32.gmra.mrb[28].mxu1 %vm624_vm0, %v1468_v17 }
 0x970   : > { %3041 = vmatprep.mubr.msk.f32.mxu1 %vm624_vm0, %v1469_v21 }
 0x973   : > { %3042 = vmatmul.mubr.msk.f32.gmra.mrb[30].mxu1 %vm624_vm0, %v1470_v23 }
 0x974   : > { %3044 = vmatprep.mubr.msk.f32.mxu1 %vm624_vm0, %v1471_v25 }
 0x977   : > { %3045 = vmatmul.mubr.msk.f32.gmra.mrb[32].mxu1 %vm624_vm0, %v1472_v27 }
 0x983   : > { %v3809_v20 = vpop.f32.mrb[14].mxu0 }
 0x984   : > { %v3811_v14 = vpop.f32.mrb[15].mxu0 }
 0x9fe   : > { %v2983_v29 = vpop.f32.mrb[8].mxu1  ;;  %v3813_v30 = vpop.f32.mrb[16].mxu0 }
 0x9ff   : > { %v1684_v31 = vmul.f32 1.442695, %v2983_v29  ;;  %v1587_v32 = vpop.f32.mrb[9].mxu1  ;;  %v2230_v33 = vmul.f32 %v3813_v30, %v3813_v30  ;;  %v3817_v34 = vpop.f32.mrb[17].mxu0  ;;  %vm1667_vm8 = vcmp.gt.f32.partialorder %v2983_v29, 0.0 }
 0xa00   : > { %v1682_v35 = vmul.f32 1.442695, %v1587_v32  ;;  %v2229_v36 = vmul.f32 %v3817_v34, %v3817_v34  ;;  %vm1666_vm9 = vcmp.gt.f32.partialorder %v1587_v32, 0.0 }
 0xa01   : > { %3291 = vpow2.f32 %v1684_v31  ;;  %2247 = vadd.xlane.f32.xlu1 %v2230_v33 }
 0xa02   : > { %3293 = vpow2.f32 %v1682_v35 }
 0xa05   : > { %2245 = vadd.xlane.f32.xlu1 %v2229_v36 }
 0xa06   : > { %v2986_v37 = vpop.f32.mrb[10].mxu1  ;;  %v3821_v38 = vpop.f32.mrb[18].mxu0 }
 0xa07   : > { %v1688_v39 = vmul.f32 1.442695, %v2986_v37  ;;  %v1597_v40 = vpop.f32.mrb[11].mxu1  ;;  %v2232_v41 = vmul.f32 %v3821_v38, %v3821_v38  ;;  %v3825_v42 = vpop.f32.mrb[19].mxu0  ;;  %vm1669_vm10 = vcmp.gt.f32.partialorder %v2986_v37, 0.0 }
 0xa08   : > { %v1686_v43 = vmul.f32 1.442695, %v1597_v40  ;;  %v2231_v45 = vmul.f32 %v3825_v42, %v3825_v42  ;;  %vm1668_vm11 = vcmp.gt.f32.partialorder %v1597_v40, 0.0 }
 0xa09   : > { %3295 = vpow2.f32 %v1688_v39  ;;  %2251 = vadd.xlane.f32.xlu1 %v2232_v41 }
 0xa0a   : > { %3297 = vpow2.f32 %v1686_v43 }
 0xa0b   : > { %v3292_v44 = vpop.eup %3291 }
 0xa0c   : > { %v3294_v46 = vpop.eup %3293  ;;  %v2637_v47 = vadd.f32 -1.0, %v3292_v44 }
 0xa0d   : > { %v2636_v48 = vadd.f32 -1.0, %v3294_v46  ;;  %2249 = vadd.xlane.f32.xlu1 %v2231_v45 }
 0xa0e   : > { %v1731_v49 = vmul.f32 1.6732632, %v2637_v47  ;;  %v2989_v50 = vpop.f32.mrb[12].mxu1  ;;  %v3830_v51 = vpop.f32.mrb[20].mxu0 }
 0xa0f   : > { %v1730_v52 = vmul.f32 1.6732632, %v2636_v48  ;;  %v1692_v53 = vmul.f32 1.442695, %v2989_v50  ;;  %v1607_v54 = vpop.f32.mrb[13].mxu1  ;;  %v2234_v55 = vmul.f32 %v3830_v51, %v3830_v51  ;;  %v3839_v58 = vpop.f32.mrb[21].mxu0 }
 0xa10   : > { %v1747_v56 = vsel %vm1667_vm8, %v2983_v29, %v1731_v49  ;;  %v1690_v57 = vmul.f32 1.442695, %v1607_v54  ;;  %v2233_v2 = vmul.f32 %v3839_v58, %v3839_v58  ;;  %vm1671_vm12 = vcmp.gt.f32.partialorder %v2989_v50, 0.0 }
 0xa11   : > { %v1763_v60 = vmul.f32 1.050701, %v1747_v56  ;;  %v1746_v62 = vsel %vm1666_vm9, %v1587_v32, %v1730_v52  ;;  %3299 = vpow2.f32 %v1692_v53  ;;  %2255 = vadd.xlane.f32.xlu1 %v2234_v55  ;;  %vm1670_vm13 = vcmp.gt.f32.partialorder %v1607_v54, 0.0 }
 0xa12   : > { %v1762_v63 = vmul.f32 1.050701, %v1746_v62  ;;  %3301 = vpow2.f32 %v1690_v57 }
 0xa13   : > { %v3296_v0 = vpop.eup %3295  ;;  %1779 = vst [vmem:[%s3837_s16 + $0x8] sm:$0xff] %v1763_v60 }
 0xa14   : > { %v3298_v1 = vpop.eup %3297  ;;  %1778 = vst [vmem:[%s3837_s16] sm:$0xff] %v1762_v63  ;;  %v2639_v3 = vadd.f32 -1.0, %v3296_v0 }
 0xa15   : > { %v2638_v4 = vadd.f32 -1.0, %v3298_v1  ;;  %2253 = vadd.xlane.f32.xlu1 %v2233_v2 }
 0xa16   : > { %v1733_v5 = vmul.f32 1.6732632, %v2639_v3  ;;  %v2992_v6 = vpop.f32.mrb[14].mxu1  ;;  %v3845_v7 = vpop.f32.mrb[22].mxu0 }
 0xa17   : > { %v1732_v8 = vmul.f32 1.6732632, %v2638_v4  ;;  %v1696_v9 = vmul.f32 1.442695, %v2992_v6  ;;  %v1617_v10 = vpop.f32.mrb[15].mxu1  ;;  %v2236_v11 = vmul.f32 %v3845_v7, %v3845_v7  ;;  %v3849_v15 = vpop.f32.mrb[23].mxu0 }
 0xa18   : > { %v1749_v12 = vsel %vm1669_vm10, %v2986_v37, %v1733_v5  ;;  %v1694_v13 = vmul.f32 1.442695, %v1617_v10  ;;  %v2235_v22 = vmul.f32 %v3849_v15, %v3849_v15  ;;  %vm1673_vm14 = vcmp.gt.f32.partialorder %v2992_v6, 0.0 }
 0xa19   : > { %v1765_v16 = vmul.f32 1.050701, %v1749_v12  ;;  %v1748_v17 = vsel %vm1668_vm11, %v1597_v40, %v1732_v8  ;;  %3303 = vpow2.f32 %v1696_v9  ;;  %2259 = vadd.xlane.f32.xlu1 %v2236_v11  ;;  %vm1672_vm15 = vcmp.gt.f32.partialorder %v1617_v10, 0.0 }
 0xa1a   : > { %v1764_v18 = vmul.f32 1.050701, %v1748_v17  ;;  %3305 = vpow2.f32 %v1694_v13 }
 0xa1b   : > { %v3300_v21 = vpop.eup %3299  ;;  %1781 = vst [vmem:[%s3837_s16 + $0x18] sm:$0xff] %v1765_v16 }
 0xa1c   : > { %v3302_v23 = vpop.eup %3301  ;;  %1780 = vst [vmem:[%s3837_s16 + $0x10] sm:$0xff] %v1764_v18  ;;  %v2641_v24 = vadd.f32 -1.0, %v3300_v21 }
 0xa1d   : > { %v2640_v25 = vadd.f32 -1.0, %v3302_v23  ;;  %2257 = vadd.xlane.f32.xlu1 %v2235_v22 }
 0xa1e   : > { %v1735_v26 = vmul.f32 1.6732632, %v2641_v24  ;;  %v2995_v27 = vpop.f32.mrb[16].mxu1 }
 0xa1f   : > { %v1734_v29 = vmul.f32 1.6732632, %v2640_v25  ;;  %v1700_v31 = vmul.f32 1.442695, %v2995_v27  ;;  %v1627_v32 = vpop.f32.mrb[17].mxu1  ;;  %vm1675_vm1 = vcmp.gt.f32.partialorder %v2995_v27, 0.0 }
 0xa20   : > { %v1751_v33 = vsel %vm1671_vm12, %v2989_v50, %v1735_v26  ;;  %v1698_v35 = vmul.f32 1.442695, %v1627_v32  ;;  %vm1674_vm2 = vcmp.gt.f32.partialorder %v1627_v32, 0.0  ;;  %vm1977_vm12 = vcmask 1040384  }
 0xa21   : > { %v1767_v36 = vmul.f32 1.050701, %v1751_v33  ;;  %v1750_v37 = vsel %vm1670_vm13, %v1607_v54, %v1734_v29  ;;  %3307 = vpow2.f32 %v1700_v31 }
 0xa22   : > { %v1766_v39 = vmul.f32 1.050701, %v1750_v37  ;;  %3309 = vpow2.f32 %v1698_v35 }
 0xa23   : > { %v3304_v40 = vpop.eup %3303  ;;  %1783 = vst [vmem:[%s3837_s16 + $0x28] sm:$0xff] %v1767_v36 }
 0xa24   : > { %v3306_v41 = vpop.eup %3305  ;;  %1782 = vst [vmem:[%s3837_s16 + $0x20] sm:$0xff] %v1766_v39  ;;  %v2643_v43 = vadd.f32 -1.0, %v3304_v40 }
 0xa25   : > { %v2642_v44 = vadd.f32 -1.0, %v3306_v41 }
 0xa26   : > { %v1737_v45 = vmul.f32 1.6732632, %v2643_v43  ;;  %v2998_v46 = vpop.f32.mrb[18].mxu1 }
 0xa27   : > { %v1736_v47 = vmul.f32 1.6732632, %v2642_v44  ;;  %v1704_v48 = vmul.f32 1.442695, %v2998_v46  ;;  %v1637_v49 = vpop.f32.mrb[19].mxu1  ;;  %vm1677_vm3 = vcmp.gt.f32.partialorder %v2998_v46, 0.0 }
 0xa28   : > { %v1753_v50 = vsel %vm1673_vm14, %v2992_v6, %v1737_v45  ;;  %v1702_v52 = vmul.f32 1.442695, %v1637_v49  ;;  %vm1676_vm4 = vcmp.gt.f32.partialorder %v1637_v49, 0.0 }
 0xa29   : > { %v1769_v53 = vmul.f32 1.050701, %v1753_v50  ;;  %v1752_v54 = vsel %vm1672_vm15, %v1617_v10, %v1736_v47  ;;  %3311 = vpow2.f32 %v1704_v48 }
 0xa2a   : > { %v1768_v55 = vmul.f32 1.050701, %v1752_v54  ;;  %3313 = vpow2.f32 %v1702_v52 }
 0xa2b   : > { %v3308_v56 = vpop.eup %3307  ;;  %1785 = vst [vmem:[%s3837_s16 + $0x38] sm:$0xff] %v1769_v53 }
 0xa2c   : > { %v3310_v57 = vpop.eup %3309  ;;  %1784 = vst [vmem:[%s3837_s16 + $0x30] sm:$0xff] %v1768_v55  ;;  %v2645_v60 = vadd.f32 -1.0, %v3308_v56 }
 0xa2d   : > { %v2644_v62 = vadd.f32 -1.0, %v3310_v57 }
 0xa2e   : > { %v1739_v63 = vmul.f32 1.6732632, %v2645_v60  ;;  %v3001_v0 = vpop.f32.mrb[20].mxu1 }
 0xa2f   : > { %v1738_v2 = vmul.f32 1.6732632, %v2644_v62  ;;  %v1708_v1 = vmul.f32 1.442695, %v3001_v0  ;;  %v1647_v3 = vpop.f32.mrb[21].mxu1  ;;  %vm1679_vm5 = vcmp.gt.f32.partialorder %v3001_v0, 0.0 }
 0xa30   : > { %v1755_v4 = vsel %vm1675_vm1, %v2995_v27, %v1739_v63  ;;  %v1706_v5 = vmul.f32 1.442695, %v1647_v3  ;;  %vm1678_vm6 = vcmp.gt.f32.partialorder %v1647_v3, 0.0  ;;  %vm2444_vm1 = vcmask 0  }
 0xa31   : > { %v1771_v6 = vmul.f32 1.050701, %v1755_v4  ;;  %v1754_v8 = vsel %vm1674_vm2, %v1627_v32, %v1738_v2  ;;  %3315 = vpow2.f32 %v1708_v1 }
 0xa32   : > { %v1770_v9 = vmul.f32 1.050701, %v1754_v8  ;;  %3317 = vpow2.f32 %v1706_v5 }
 0xa33   : > { %v3312_v10 = vpop.eup %3311  ;;  %1787 = vst [vmem:[%s3837_s16 + $0x48] sm:$0xff] %v1771_v6 }
 0xa34   : > { %v3314_v11 = vpop.eup %3313  ;;  %1786 = vst [vmem:[%s3837_s16 + $0x40] sm:$0xff] %v1770_v9  ;;  %v2647_v12 = vadd.f32 -1.0, %v3312_v10 }
 0xa35   : > { %v2646_v13 = vadd.f32 -1.0, %v3314_v11 }
 0xa36   : > { %v1741_v16 = vmul.f32 1.6732632, %v2647_v12  ;;  %v3004_v17 = vpop.f32.mrb[22].mxu1 }
 0xa37   : > { %v1740_v18 = vmul.f32 1.6732632, %v2646_v13  ;;  %v1712_v21 = vmul.f32 1.442695, %v3004_v17  ;;  %v1657_v22 = vpop.f32.mrb[23].mxu1  ;;  %vm1681_vm7 = vcmp.gt.f32.partialorder %v3004_v17, 0.0 }
 0xa38   : > { %v1757_v23 = vsel %vm1677_vm3, %v2998_v46, %v1741_v16  ;;  %v1710_v24 = vmul.f32 1.442695, %v1657_v22  ;;  %vm1680_vm8 = vcmp.gt.f32.partialorder %v1657_v22, 0.0 }
 0xa39   : > { %v1773_v25 = vmul.f32 1.050701, %v1757_v23  ;;  %v1756_v26 = vsel %vm1676_vm4, %v1637_v49, %v1740_v18  ;;  %3319 = vpow2.f32 %v1712_v21 }
 0xa3a   : > { %v1772_v27 = vmul.f32 1.050701, %v1756_v26  ;;  %3321 = vpow2.f32 %v1710_v24  ;;  %v3861_v29 = vpop.f32.mrb[24].mxu1 }
 0xa3b   : > { %v3316_v31 = vpop.eup %3315  ;;  %1789 = vst [vmem:[%s3837_s16 + $0x58] sm:$0xff] %v1773_v25  ;;  %v3018_v32 = vpop.f32.mrb[25].mxu1 }
 0xa3c   : > { %v3318_v33 = vpop.eup %3317  ;;  %1788 = vst [vmem:[%s3837_s16 + $0x50] sm:$0xff] %v1772_v27  ;;  %v2649_v35 = vadd.f32 -1.0, %v3316_v31 }
 0xa3d   : > { %v2648_v36 = vadd.f32 -1.0, %v3318_v33 }
 0xa3e   : > { %v1743_v37 = vmul.f32 1.6732632, %v2649_v35  ;;  %v3865_v39 = vpop.f32.mrb[26].mxu1 }
 0xa3f   : > { %v1742_v40 = vmul.f32 1.6732632, %v2648_v36  ;;  %v3867_v41 = vpop.f32.mrb[27].mxu1  ;;  %v2238_v43 = vmul.f32 %v3865_v39, %v3865_v39 }
 0xa40   : > { %v1759_v44 = vsel %vm1679_vm5, %v3001_v0, %v1743_v37  ;;  %v2237_v52 = vmul.f32 %v3867_v41, %v3867_v41 }
 0xa41   : > { %v1775_v45 = vmul.f32 1.050701, %v1759_v44  ;;  %v1758_v46 = vsel %vm1678_vm6, %v1647_v3, %v1742_v40  ;;  %2263 = vadd.xlane.f32.xlu1 %v2238_v43 }
 0xa42   : > { %v1774_v47 = vmul.f32 1.050701, %v1758_v46  ;;  %v3871_v48 = vpop.f32.mrb[28].mxu1 }
 0xa43   : > { %v3320_v49 = vpop.eup %3319  ;;  %1791 = vst [vmem:[%s3837_s16 + $0x68] sm:$0xff] %v1775_v45  ;;  %v3874_v50 = vpop.f32.mrb[29].mxu1  ;;  %v2240_v0 = vmul.f32 %v3871_v48, %v3871_v48 }
 0xa44   : > { %v3322_v53 = vpop.eup %3321  ;;  %1790 = vst [vmem:[%s3837_s16 + $0x60] sm:$0xff] %v1774_v47  ;;  %v2651_v54 = vadd.f32 -1.0, %v3320_v49  ;;  %v2239_v8 = vmul.f32 %v3874_v50, %v3874_v50 }
 0xa45   : > { %v2650_v55 = vadd.f32 -1.0, %v3322_v53  ;;  %2261 = vadd.xlane.f32.xlu1 %v2237_v52 }
 0xa46   : > { %v1745_v56 = vmul.f32 1.6732632, %v2651_v54  ;;  %v3879_v57 = vpop.f32.mrb[30].mxu1 }
 0xa47   : > { %v1744_v60 = vmul.f32 1.6732632, %v2650_v55  ;;  %v3881_v62 = vpop.f32.mrb[31].mxu1  ;;  %v2242_v63 = vmul.f32 %v3879_v57, %v3879_v57 }
 0xa48   : > { %v1761_v2 = vsel %vm1681_vm7, %v3004_v17, %v1745_v56  ;;  %v2241_v9 = vmul.f32 %v3881_v62, %v3881_v62 }
 0xa49   : > { %v1777_v1 = vmul.f32 1.050701, %v1761_v2  ;;  %v1760_v3 = vsel %vm1680_vm8, %v1657_v22, %v1744_v60  ;;  %2271 = vadd.xlane.f32.xlu0 %v2242_v63  ;;  %2267 = vadd.xlane.f32.xlu1 %v2240_v0 }
 0xa4a   : > { %v1776_v4 = vmul.f32 1.050701, %v1760_v3  ;;  %v3046_v5 = vpop.f32.mrb[32].mxu1 }
 0xa4b   : > { %1793 = vst [vmem:[%s3837_s16 + $0x78] sm:$0xff] %v1777_v1  ;;  %v2121_v6 = vpop.f32.mrb[33].mxu1  ;;  %v2244_v11 = vmul.f32 %v3046_v5, %v3046_v5 }
 0xa4c   : > { %1792 = vst [vmem:[%s3837_s16 + $0x70] sm:$0xff] %v1776_v4  ;;  %v2243_v10 = vmul.f32 %v2121_v6, %v2121_v6 }
 0xa4d   : > { %2265 = vadd.xlane.f32.xlu1 %v2239_v8 }
 0xa51   : > { %2269 = vadd.xlane.f32.xlu1 %v2241_v9 }
 0xa55   : > { %2273 = vadd.xlane.f32.xlu1 %v2243_v10 }
 0xa59   : > { %2275 = vadd.xlane.f32.xlu1 %v2244_v11 }
 0xa8e   : > { %v2248_v12 = vpop.xlane.xlu1 %2247 }
 0xa92   : > { %v2246_v13 = vpop.xlane.xlu1 %2245 }
 0xa93   : > { %v2277_v22 = vadd.f32 %v2248_v12, %v2246_v13 }
 0xa96   : > { %v2252_v16 = vpop.xlane.xlu1 %2251 }
 0xa9a   : > { %v2250_v17 = vpop.xlane.xlu1 %2249 }
 0xa9b   : > { %v2278_v23 = vadd.f32 %v2277_v22, %v2250_v17  ;;  %v2130_v22 = vlaneseq }
 0xa9d   : > { %v2279_v25 = vadd.f32 %v2278_v23, %v2252_v16 }
 0xa9e   : > { %v2256_v18 = vpop.xlane.xlu1 %2255 }
 0xaa2   : > { %v2254_v21 = vpop.xlane.xlu1 %2253 }
 0xaa3   : > { %v2280_v26 = vadd.f32 %v2279_v25, %v2254_v21  ;;  %v2148_v25 = vand.u32 127, %v2130_v22 }
 0xaa5   : > { %v2281_v31 = vadd.f32 %v2280_v26, %v2256_v18 }
 0xaa6   : > { %v2260_v24 = vpop.xlane.xlu1 %2259 }
 0xaaa   : > { %v2258_v27 = vpop.xlane.xlu1 %2257 }
 0xaab   : > { %v2282_v33 = vadd.f32 %v2281_v31, %v2258_v27 }
 0xaad   : > { %v2283_v36 = vadd.f32 %v2282_v33, %v2260_v24 }
 0xace   : > { %v2264_v32 = vpop.xlane.xlu1 %2263 }
 0xad2   : > { %v2262_v35 = vpop.xlane.xlu1 %2261 }
 0xad3   : > { %v2284_v37 = vadd.f32 %v2283_v36, %v2262_v35 }
 0xad5   : > { %v2285_v43 = vadd.f32 %v2284_v37, %v2264_v32 }
 0xad6   : > { %v2268_v40 = vpop.xlane.xlu1 %2267  ;;  %v2272_v52 = vpop.xlane.xlu0 %2271 }
 0xada   : > { %v2266_v44 = vpop.xlane.xlu1 %2265 }
 0xadb   : > { %v2286_v45 = vadd.f32 %v2285_v43, %v2266_v44  ;;  %v2423_v43 = vadd.f32 %v3764_v61, %v3761_v59 }
 0xadd   : > { %v2287_v46 = vadd.f32 %v2286_v45, %v2268_v40  ;;  %v2424_v45 = vrot.slane %v2423_v43, 4 }
 0xade   : > { %v2270_v47 = vpop.xlane.xlu1 %2269 }
 0xadf   : > { %v2288_v49 = vadd.f32 %v2287_v46, %v2270_v47  ;;  %v2425_v46 = vadd.f32 %v2424_v45, %v2423_v43 }
 0xae1   : > { %v2289_v53 = vadd.f32 %v2288_v49, %v2272_v52 }
 0xae2   : > { %v2274_v54 = vpop.xlane.xlu1 %2273 }
 0xae3   : > { %v2290_v55 = vadd.f32 %v2289_v53, %v2274_v54  ;;  %v1876_v53 = vmul.f32 %v3809_v20, %v3764_v61 }
 0xae6   : > { %v2276_v56 = vpop.xlane.xlu1 %2275 }
 0xae7   : > { %v2291_v60 = vadd.f32 %v2290_v55, %v2276_v56  ;;  %v1976_v56 = vmul.f32 %v3861_v29, %v3861_v29 }
 0xae9   : > { %v2292_v63 = vrot.slane %v2291_v60, 4 }
 0xaeb   : > { %v2293_v0 = vadd.f32 %v2292_v63, %v2291_v60  ;;  %v1978_v60 = vsel %vm1977_vm12, %v1976_v56, 0.0 }
 0xaed   : > { %v2294_v2 = vrot.slane %v2293_v0, 2 }
 0xaef   : > { %v2295_v1 = vadd.f32 %v2294_v2, %v2293_v0 }
 0xaf1   : > { %v2296_v3 = vrot.slane %v2295_v1, 1 }
 0xaf3   : > { %v2297_v4 = vadd.f32 %v2296_v3, %v2295_v1 }
 0xaf5   : > { %3323 = vrsqrt.f32 %v2297_v4 }
 0xaff   : > { %v3324_v8 = vpop.eup %3323 }
 0xb00   : > { %v2300_v9 = vmul.f32 %v3324_v8, %v3813_v30  ;;  %v2301_v11 = vmul.f32 %v3324_v8, %v3825_v42  ;;  %v2313_v12 = vmul.f32 %v3324_v8, %v2121_v6  ;;  %v2314_v13 = vmul.f32 %v3324_v8, %v3046_v5 }
 0xb01   : > { %v2302_v17 = vmul.f32 %v3324_v8, %v3821_v38  ;;  %v2303_v21 = vmul.f32 %v3324_v8, %v3839_v58  ;;  %v2304_v24 = vmul.f32 %v3324_v8, %v3830_v51  ;;  %v2131_v30 = vshrl.u32 %v2130_v22, 7 }
 0xb02   : > { %v2348_v10 = vmul.f32 %v2300_v9, %v2300_v9  ;;  %v2349_v16 = vmul.f32 %v2301_v11, %v2301_v11  ;;  %v2305_v42 = vmul.f32 %v3324_v8, %v3849_v15  ;;  %v2306_v38 = vmul.f32 %v3324_v8, %v3845_v7 }
 0xb03   : > { %v2350_v18 = vmul.f32 %v2302_v17, %v2302_v17  ;;  %v2351_v23 = vmul.f32 %v2303_v21, %v2303_v21  ;;  %v2352_v26 = vmul.f32 %v2304_v24, %v2304_v24  ;;  %vm2149_vm9 = vcmp.eq.s32.totalorder %v2131_v30, %v2148_v25 }
 0xb04   : > { %2365 = vadd.xlane.f32.xlu1 %v2348_v10  ;;  %vm2165_vm10 = vcmp.lt.s32.totalorder %v2131_v30, 4  ;;  %v2353_v5 = vmul.f32 %v2305_v42, %v2305_v42  ;;  %v2354_v58 = vmul.f32 %v2306_v38, %v2306_v38  ;;  %v2307_v6 = vmul.f32 %v3324_v8, %v3867_v41 }
 0xb05   : > { %vm2181_vm11 = vmand %vm2149_vm9, %vm2165_vm10  ;;  %v2308_v31 = vmul.f32 %v3324_v8, %v3865_v39  ;;  %v2299_v32 = vmul.f32 %v3324_v8, %v3817_v34  ;;  %v2309_v7 = vmul.f32 %v3324_v8, %v3874_v50  ;;  %v2310_v41 = vmul.f32 %v3324_v8, %v3871_v48 }
 0xb06   : > { %v2671_v27 = vsel %vm2181_vm11, 1.0, %v3341_v28  ;;  %v2355_v51 = vmul.f32 %v2307_v6, %v2307_v6  ;;  %v2311_v40 = vmul.f32 %v3324_v8, %v3881_v62  ;;  %v2312_v34 = vmul.f32 %v3324_v8, %v3879_v57 }
 0xb07   : > { %v2315_v15 = vmul.f32 0.5, %v2671_v27  ;;  %v2356_v33 = vmul.f32 %v2308_v31, %v2308_v31  ;;  %v2357_v37 = vmul.f32 %v2309_v7, %v2309_v7  ;;  %v2358_v28 = vmul.f32 %v2310_v41, %v2310_v41 }
 0xb08   : > { %2367 = vadd.xlane.f32.xlu1 %v2349_v16  ;;  %v2359_v39 = vmul.f32 %v2311_v40, %v2311_v40  ;;  %v2360_v44 = vmul.f32 %v2312_v34, %v2312_v34  ;;  %v2361_v50 = vmul.f32 %v2313_v12, %v2313_v12  ;;  %v2362_v47 = vmul.f32 %v2314_v13, %v2314_v13 }
 0xb09   : > { %v2331_v35 = vsub.f32 %v2299_v32, %v2315_v15  ;;  %v2426_v48 = vrot.slane %v2425_v46, 2  ;;  %v1897_v62 = vsel %vm624_vm0, %v3795_v19, 0.0  ;;  %v1875_v57 = vmul.f32 %v3811_v14, %v3761_v59 }
 0xb0b   : > { %v2347_v36 = vmul.f32 %v2331_v35, %v2331_v35  ;;  %v2427_v49 = vadd.f32 %v2426_v48, %v2425_v46 }
 0xb0c   : > { %2369 = vadd.xlane.f32.xlu1 %v2350_v18 }
 0xb0d   : > { %v2428_v52 = vrot.slane %v2427_v49, 1 }
 0xb0f   : > { %v2429_v54 = vadd.f32 %v2428_v52, %v2427_v49 }
 0xb10   : > { %2371 = vadd.xlane.f32.xlu1 %v2351_v23 }
 0xb11   : > { %v2430_v55 = vmul.f32 %v2429_v54, %v2429_v54 }
 0xb14   : > { %2373 = vadd.xlane.f32.xlu1 %v2352_v26 }
 0xb18   : > { %2375 = vadd.xlane.f32.xlu1 %v2353_v5 }
 0xb1c   : > { %2377 = vadd.xlane.f32.xlu1 %v2354_v58 }
 0xb20   : > { %2379 = vadd.xlane.f32.xlu1 %v2355_v51 }
 0xb24   : > { %2381 = vadd.xlane.f32.xlu1 %v2356_v33 }
 0xb28   : > { %2363 = vadd.xlane.f32.xlu1 %v2347_v36 }
 0xb2c   : > { %2383 = vadd.xlane.f32.xlu1 %v2357_v37 }
 0xb30   : > { %2385 = vadd.xlane.f32.xlu1 %v2358_v28 }
 0xb34   : > { %2387 = vadd.xlane.f32.xlu1 %v2359_v39 }
 0xb38   : > { %2389 = vadd.xlane.f32.xlu1 %v2360_v44 }
 0xb3c   : > { %2391 = vadd.xlane.f32.xlu1 %v2361_v50 }
 0xb40   : > { %2393 = vadd.xlane.f32.xlu1 %v2362_v47 }
 0xb44   : > { %1898 = vadd.xlane.f32.xlu1 %v1897_v62 }
 0xb48   : > { %1877 = vadd.xlane.f32.xlu1 %v1875_v57 }
 0xb4c   : > { %1879 = vadd.xlane.f32.xlu1 %v1876_v53 }
 0xb50   : > { %2431 = vadd.xlane.f32.xlu1 %v2430_v55 }
 0xb54   : > { %1979 = vadd.xlane.f32.xlu1 %v1978_v60 }
 0xb91   : > { %v2366_v19 = vpop.xlane.xlu1 %2365 }
 0xb95   : > { %v2368_v63 = vpop.xlane.xlu1 %2367 }
 0xb99   : > { %v2370_v0 = vpop.xlane.xlu1 %2369 }
 0xb9d   : > { %v2372_v2 = vpop.xlane.xlu1 %2371 }
 0xba1   : > { %v2374_v59 = vpop.xlane.xlu1 %2373 }
 0xba5   : > { %v2376_v14 = vpop.xlane.xlu1 %2375 }
 0xba9   : > { %v2378_v1 = vpop.xlane.xlu1 %2377 }
 0xbad   : > { %v2380_v3 = vpop.xlane.xlu1 %2379 }
 0xbb1   : > { %v2382_v4 = vpop.xlane.xlu1 %2381 }
 0xbb5   : > { %v2364_v61 = vpop.xlane.xlu1 %2363 }
 0xbb6   : > { %v2395_v20 = vadd.f32 %v2366_v19, %v2364_v61 }
 0xbb8   : > { %v2396_v8 = vadd.f32 %v2395_v20, %v2368_v63 }
 0xbb9   : > { %v2384_v9 = vpop.xlane.xlu1 %2383 }
 0xbba   : > { %v2397_v10 = vadd.f32 %v2396_v8, %v2370_v0 }
 0xbbc   : > { %v2398_v11 = vadd.f32 %v2397_v10, %v2372_v2 }
 0xbbd   : > { %v2386_v29 = vpop.xlane.xlu1 %2385 }
 0xbbe   : > { %v2399_v12 = vadd.f32 %v2398_v11, %v2374_v59 }
 0xbc0   : > { %v2400_v13 = vadd.f32 %v2399_v12, %v2376_v14 }
 0xbc1   : > { %v2388_v16 = vpop.xlane.xlu1 %2387 }
 0xbc2   : > { %v2401_v17 = vadd.f32 %v2400_v13, %v2378_v1 }
 0xbc4   : > { %v2402_v18 = vadd.f32 %v2401_v17, %v2380_v3 }
 0xbc5   : > { %v2390_v21 = vpop.xlane.xlu1 %2389 }
 0xbc6   : > { %v2403_v22 = vadd.f32 %v2402_v18, %v2382_v4 }
 0xbc8   : > { %v2404_v23 = vadd.f32 %v2403_v22, %v2384_v9 }
 0xbc9   : > { %v2392_v24 = vpop.xlane.xlu1 %2391 }
 0xbca   : > { %v2405_v30 = vadd.f32 %v2404_v23, %v2386_v29 }
 0xbcc   : > { %v2406_v25 = vadd.f32 %v2405_v30, %v2388_v16 }
 0xbcd   : > { %v2394_v26 = vpop.xlane.xlu1 %2393 }
 0xbce   : > { %v2407_v42 = vadd.f32 %v2406_v25, %v2390_v21 }
 0xbd0   : > { %v2408_v5 = vadd.f32 %v2407_v42, %v2392_v24 }
 0xbd1   : > { %v1899_v38 = vpop.xlane.xlu1 %1898 }
 0xbd2   : > { %v2409_v58 = vadd.f32 %v2408_v5, %v2394_v26  ;;  %v1900_v6 = vmul.f32 0.5, %v1899_v38 }
 0xbd4   : > { %v2410_v27 = vrot.slane %v2409_v58, 4  ;;  %v1901_v51 = vmul.f32 2.0, %v1900_v6 }
 0xbd5   : > { %v1878_v31 = vpop.xlane.xlu1 %1877 }
 0xbd6   : > { %v2411_v32 = vadd.f32 %v2410_v27, %v2409_v58  ;;  %3325 = vrcp.f32 %v1901_v51 }
 0xbd8   : > { %v2412_v15 = vrot.slane %v2411_v32, 2 }
 0xbd9   : > { %v1880_v33 = vpop.xlane.xlu1 %1879 }
 0xbda   : > { %v2413_v35 = vadd.f32 %v2412_v15, %v2411_v32  ;;  %v1881_v36 = vadd.f32 %v1880_v33, %v1878_v31 }
 0xbdc   : > { %v2414_v7 = vrot.slane %v2413_v35, 1  ;;  %v1882_v37 = vrot.slane %v1881_v36, 4 }
 0xbdd   : > { %v2432_v41 = vpop.xlane.xlu1 %2431 }
 0xbde   : > { %v2415_v28 = vadd.f32 %v2414_v7, %v2413_v35  ;;  %v1883_v40 = vadd.f32 %v1882_v37, %v1881_v36  ;;  %3327 = vrsqrt.f32 %v2432_v41  ;;  %vm2435_vm0 = vcmp.eq.f32.partialorder %v2432_v41, inf }
 0xbdf   : > { %v2438_v57 = vand.u32 2147483648, %v2432_v41  ;;  %vm2437_vm13 = vcmp.eq.f32.partialorder %v2432_v41, 0.0 }
 0xbe0   : > { %3329 = vrsqrt.f32 %v2415_v28  ;;  %v1884_v39 = vrot.slane %v1883_v40, 2  ;;  %v3326_v43 = vpop.eup %3325  ;;  %vm2418_vm14 = vcmp.eq.f32.partialorder %v2415_v28, inf  ;;  %v2421_v55 = vand.u32 2147483648, %v2415_v28 }
 0xbe1   : > { %v1980_v44 = vpop.xlane.xlu1 %1979  ;;  %vm2420_vm15 = vcmp.eq.f32.partialorder %v2415_v28, 0.0 }
 0xbe2   : > { %v1885_v34 = vadd.f32 %v1884_v39, %v1883_v40  ;;  %v1981_v46 = vmul.f32 %v3326_v43, %v1980_v44 }
 0xbe4   : > { %v1886_v45 = vrot.slane %v1885_v34, 1 }
 0xbe6   : > { %v1887_v50 = vadd.f32 %v1886_v45, %v1885_v34 }
 0xbe8   : > { %v3328_v47 = vpop.eup %3327  ;;  %v1982_v48 = vsub.f32 %v1887_v50, %v1981_v46 }
 0xbe9   : > { %v2434_v62 = vmul.f32 %v3328_v47, %v2432_v41 }
 0xbea   : > { %v3330_v49 = vpop.eup %3329  ;;  %v1983_v52 = vsub.f32 0.0, %v1982_v48 }
 0xbeb   : > { %v2436_v53 = vsel %vm2435_vm0, %v2432_v41, %v2434_v62  ;;  %v2417_v54 = vmul.f32 %v3330_v49, %v2415_v28 }
 0xbec   : > { %v2439_v56 = vsel %vm2437_vm13, %v2438_v57, %v2436_v53  ;;  %v1984_v60 = vmul.f32 %v3326_v43, %v1983_v52 }
 0xbed   : > { %v2419_v19 = vsel %vm2418_vm14, %v2415_v28, %v2417_v54  ;;  %v2440_v63 = vmul.f32 0.125, %v2439_v56 }
 0xbee   : > { %v2422_v0 = vsel %vm2420_vm15, %v2421_v55, %v2419_v19 }
 0xbef   : > { %v2672_v2 = vadd.f32 -1.0, %v2440_v63  ;;  %v2442_v59 = vadd.f32 %v2422_v0, %v1984_v60 }
 0xbf1   : > { %v2443_v14 = vadd.f32 %v2672_v2, %v2442_v59 }
 0xbf3   : > { %2445 = vst.msk [vmem:[%s584_s26] sm:$0x1] %vm2444_vm1, %v2443_v14 }
 0xbf4 PF: > { %s25_s29 = sadd.s32 1, %s3337_s29  }
 0xbf5   : > { %p22_p4 = scmp.ge.s32.totalorder %s25_s29, 4  }
 0xbf7   :  { %24 = sbr.rel (!%p22_p4) target bundleno = 1 (0x1), region = 132 }

</bundles_post_ra>
